<compile_context>
chip_gen: v6e
topology: v6e:2x2x1
jax: 0.10.0
libtpu: 0.0.40
codegen_flags: <defaults>
</compile_context>

<pallas_src>
import functools

import jax
import jax.numpy as jnp
import numpy as np
from jax.experimental import pallas as pl
from jax.experimental.pallas import tpu as pltpu

_BN_EPS = 1e-5
_LANE = 128


def _vmem_limit_bytes():
    """Generation-aware VMEM scoped limit (v7x has only 64 MiB per TensorCore)."""
    cap = 64 * 1024 * 1024
    try:
        info = pltpu.get_tpu_info()
        cap = int(getattr(info, "vmem_capacity_bytes", cap))
    except Exception:
        pass
    return min(cap * 3 // 4, 96 * 1024 * 1024)


_VMEM_LIMIT = _vmem_limit_bytes()


def _compiler_params(sems):
    return pltpu.CompilerParams(dimension_semantics=sems, vmem_limit_bytes=_VMEM_LIMIT)


# ---------------------------------------------------------------------------
# Pallas kernels
# ---------------------------------------------------------------------------
def _conv_bn_kernel(*refs, taps, nrows, tm, relu, has_res):
    """Fused implicit-im2col conv + BN(scale,bias) [+ residual] [+ ReLU].

    refs: x (1,P,L,Cin) bf16, w (T,Cin,tco) bf16, scale (1,tco) f32, bias (1,tco) f32,
          [res (1,Ro,tco) bf16,]  out (1,Ro,tco) bf16.
    taps: static tuple of (phase_index, row_offset) per kernel tap.

    Accumulation is carried in vregs over row chunks of `tm` rows (no VMEM scratch RMW);
    the first tap's matmul initializes the accumulator directly.
    """
    if has_res:
        x_ref, w_ref, sc_ref, bi_ref, res_ref, o_ref = refs
    else:
        x_ref, w_ref, sc_ref, bi_ref, o_ref = refs
        res_ref = None

    sc = sc_ref[...]
    bi = bi_ref[...]
    for s in range(0, nrows, tm):
        sz = min(tm, nrows - s)
        ph0, off0 = taps[0]
        acc = jnp.dot(x_ref[0, ph0, s + off0:s + off0 + sz, :], w_ref[0],
                      preferred_element_type=jnp.float32)
        for t in range(1, len(taps)):
            ph, off = taps[t]
            acc = acc + jnp.dot(x_ref[0, ph, s + off:s + off + sz, :], w_ref[t],
                                preferred_element_type=jnp.float32)
        y = acc * sc + bi                                   # f32 epilogue (BN folded)
        if has_res:
            y = y + res_ref[0, s:s + sz, :].astype(jnp.float32)
        if relu:
            y = jnp.maximum(y, 0.0)
        o_ref[0, s:s + sz, :] = y.astype(o_ref.dtype)


def _maxpool_kernel(x_ref, o_ref, *, taps, nrows):
    """Max over KH*KW taps, reduced fully in VMEM (no HBM tap stack)."""
    ph0, off0 = taps[0]
    m = x_ref[0, ph0, off0:off0 + nrows, :]
    for ph, off in taps[1:]:
        m = jnp.maximum(m, x_ref[0, ph, off:off + nrows, :])
    o_ref[0] = m


def _avgpool_fc_kernel(x_ref, w_ref, b_ref, o_ref):
    """Fused global average pool + FC for the whole batch in one step."""
    xm = jnp.mean(x_ref[...].astype(jnp.float32), axis=1)              # (N, C)
    o_ref[...] = jnp.dot(xm, w_ref[...], preferred_element_type=jnp.float32) + b_ref[...]


# ---------------------------------------------------------------------------
# Glue: phase decomposition / flattening (XLA data movement, ~1x input size)
# ---------------------------------------------------------------------------
def _phase_flatten(x, kh, kw, stride, pad, pad_value):
    """Pad + stride-phase-decompose + flatten x so every conv/pool tap becomes a
    contiguous row window of a (N, P, L, C) array.  Returns (xs, taps, Ho, Wo, Ws)."""
    N, H, W, C = x.shape
    Ho = (H + 2 * pad - kh) // stride + 1
    Wo = (W + 2 * pad - kw) // stride + 1
    mdi, mdj = (kh - 1) // stride, (kw - 1) // stride
    Hs, Ws = Ho + mdi, Wo + mdj
    Hneed, Wneed = stride * Hs, stride * Ws
    xp = jnp.pad(x, ((0, 0), (pad, Hneed - H - pad), (pad, Wneed - W - pad), (0, 0)),
                 constant_values=pad_value)
    phases = sorted({(i % stride, j % stride) for i in range(kh) for j in range(kw)})
    pidx = {p: k for k, p in enumerate(phases)}
    slabs = [xp[:, pi::stride, pj::stride, :] for (pi, pj) in phases]   # each (N,Hs,Ws,C)
    xs = jnp.stack(slabs, axis=1)                                       # (N,P,Hs,Ws,C)
    xs = jnp.pad(xs, ((0, 0), (0, 0), (0, 1), (0, 0), (0, 0)),
                 constant_values=pad_value)                             # halo row for flatten
    xs = xs.reshape(N, len(phases), (Hs + 1) * Ws, C)
    taps = tuple((pidx[(i % stride, j % stride)], (i // stride) * Ws + (j // stride))
                 for i in range(kh) for j in range(kw))
    return xs, taps, Ho, Wo, Ws


# ---------------------------------------------------------------------------
# Pallas wrappers
# ---------------------------------------------------------------------------
def conv_bn(x, wt, scale, bias, *, kh, kw, stride, pad, relu, residual=None):
    """x: (N,H,W,Cin) bf16 (channels lane-padded to 128); wt: (kh*kw, Cin, Cout) bf16 tap-major;
       scale/bias: (1, Cout) f32 (BN folded).  residual: optional (N,Ho,Wo,Cout) bf16 added
       before the final ReLU.  Returns (N, Ho, Wo, Cout) bf16."""
    N, H, W, Cin = x.shape
    T, Cin_w, Cout = wt.shape
    assert T == kh * kw and Cin_w == Cin
    xs, taps, Ho, Wo, Ws = _phase_flatten(x, kh, kw, stride, pad, 0.0)
    P, L = xs.shape[1], xs.shape[2]
    Ro = Ho * Ws                                   # rows incl. (kw-1)//stride junk columns
    tco = 256 if Cout % 256 == 0 else _LANE        # 256-wide rhs fills the v6e/v7x MXU
    n_co = Cout // tco
    tm = max(8, 32768 // tco)                      # vreg-resident accumulator chunk (rows)

    inputs = [xs, wt, scale, bias]
    in_specs = [
        pl.BlockSpec((1, P, L, Cin), lambda n, co: (n, 0, 0, 0)),
        pl.BlockSpec((T, Cin, tco), lambda n, co: (0, 0, co)),
        pl.BlockSpec((1, tco), lambda n, co: (0, co)),
        pl.BlockSpec((1, tco), lambda n, co: (0, co)),
    ]
    has_res = residual is not None
    if has_res:
        assert residual.shape == (N, Ho, Wo, Cout)
        res = jnp.pad(residual, ((0, 0), (0, 0), (0, Ws - Wo), (0, 0)))
        inputs.append(res.reshape(N, Ro, Cout).astype(jnp.bfloat16))
        in_specs.append(pl.BlockSpec((1, Ro, tco), lambda n, co: (n, 0, co)))

    cost = pl.CostEstimate(                                   # advisory only (counts padding)
        flops=int(2 * N * Ro * T * Cin * Cout),
        transcendentals=0,
        bytes_accessed=int(xs.size * xs.dtype.itemsize
                           + N * wt.size * wt.dtype.itemsize
                           + (2 if has_res else 1) * N * Ro * Cout * 2
                           + (scale.size + bias.size) * 4),
    )

    out = pl.pallas_call(
        functools.partial(_conv_bn_kernel, taps=taps, nrows=Ro, tm=tm,
                          relu=relu, has_res=has_res),
        out_shape=jax.ShapeDtypeStruct((N, Ro, Cout), jnp.bfloat16),
        grid=(N, n_co),
        in_specs=in_specs,
        out_specs=pl.BlockSpec((1, Ro, tco), lambda n, co: (n, 0, co)),
        compiler_params=_compiler_params(("parallel", "parallel")),
        cost_estimate=cost,
    )(*inputs)
    # Drop the junk columns; XLA fuses this slice into the next op's padding pass.
    return out.reshape(N, Ho, Ws, Cout)[:, :, :Wo, :]


def stem_conv_bn(x, wt, scale, bias, *, stride):
    """7x7/stride-s stem conv (Cin=3): explicit im2col folds the 49 taps into the contraction
    dim (K = 147 -> padded to 256), then the generic fused matmul+BN+ReLU kernel runs once."""
    N, H, W, C = x.shape
    kh = kw = 7
    pad = 3
    Ho = (H + 2 * pad - kh) // stride + 1
    Wo = (W + 2 * pad - kw) // stride + 1
    xp = jnp.pad(x, ((0, 0), (pad, pad), (pad, pad), (0, 0)))
    cols = [xp[:, i:i + stride * Ho:stride, j:j + stride * Wo:stride, :]
            for i in range(kh) for j in range(kw)]
    xim = jnp.concatenate(cols, axis=-1)                      # (N, Ho, Wo, kh*kw*C)
    k_pad = wt.shape[1]
    xim = jnp.pad(xim, ((0, 0), (0, 0), (0, 0), (0, k_pad - kh * kw * C)))
    return conv_bn(xim.astype(jnp.bfloat16), wt, scale, bias,
                   kh=1, kw=1, stride=1, pad=0, relu=True)


def maxpool_3x3_s2(x):
    """MaxPool2d(kernel=3, stride=2, padding=1); -1e30 padding is safe post-ReLU."""
    N, H, W, C = x.shape
    xs, taps, Ho, Wo, Ws = _phase_flatten(x, 3, 3, 2, 1, -1e30)
    P, L = xs.shape[1], xs.shape[2]
    Ro = Ho * Ws
    out = pl.pallas_call(
        functools.partial(_maxpool_kernel, taps=taps, nrows=Ro),
        out_shape=jax.ShapeDtypeStruct((N, Ro, C), x.dtype),
        grid=(N,),
        in_specs=[pl.BlockSpec((1, P, L, C), lambda n: (n, 0, 0, 0))],
        out_specs=pl.BlockSpec((1, Ro, C), lambda n: (n, 0, 0)),
        compiler_params=_compiler_params(("parallel",)),
    )(xs)
    return out.reshape(N, Ho, Ws, C)[:, :, :Wo, :]


def avgpool_fc(x, fc_w, fc_b, num_classes):
    """Fused global avgpool + FC over the whole batch in one grid step.
       x: (N,H,W,512) bf16; fc_w: (512, NP) f32; fc_b: (1, NP) f32."""
    N, H, W, C = x.shape
    NP = fc_w.shape[1]
    x3 = x.reshape(N, H * W, C)
    out = pl.pallas_call(
        _avgpool_fc_kernel,
        out_shape=jax.ShapeDtypeStruct((N, NP), jnp.float32),
        grid=(1,),
        in_specs=[pl.BlockSpec((N, H * W, C), lambda i: (0, 0, 0)),
                  pl.BlockSpec((C, NP), lambda i: (0, 0)),
                  pl.BlockSpec((1, NP), lambda i: (0, 0))],
        out_specs=pl.BlockSpec((N, NP), lambda i: (0, 0)),
        compiler_params=_compiler_params(("arbitrary",)),
    )(x3, fc_w, fc_b)
    return out[:, :num_classes]


# ---------------------------------------------------------------------------
# Model
# ---------------------------------------------------------------------------
def basic_block(x, p, stride):
    identity = x
    if "down_w" in p:
        identity = conv_bn(x, p["down_w"], p["down_s"], p["down_b"],
                           kh=1, kw=1, stride=stride, pad=0, relu=False)
    out = conv_bn(x, p["conv1_w"], p["bn1_s"], p["bn1_b"],
                  kh=3, kw=3, stride=stride, pad=1, relu=True)
    # Second conv: BN + residual add + ReLU all fused into the epilogue.
    out = conv_bn(out, p["conv2_w"], p["bn2_s"], p["bn2_b"],
                  kh=3, kw=3, stride=1, pad=1, relu=True, residual=identity)
    return out


def resnet_forward(x_nchw, params, *, num_classes, stride_cfg=32):
    x = jnp.transpose(x_nchw, (0, 2, 3, 1)).astype(jnp.bfloat16)     # NCHW -> NHWC, bf16
    conv1_stride = 1 if stride_cfg <= 16 else 2
    x = stem_conv_bn(x, params["conv1_w"], params["conv1_s"], params["conv1_b"],
                     stride=conv1_stride)
    if stride_cfg >= 16:
        x = maxpool_3x3_s2(x)
    for li in range(1, 5):
        for bi, blk in enumerate(params[f"layer{li}"]):
            stride = 2 if (li > 1 and bi == 0) else 1
            x = basic_block(x, blk, stride)
    return avgpool_fc(x, params["fc_w"], params["fc_b"], num_classes)


# ---------------------------------------------------------------------------
# Deterministic, kernel-ready parameter construction (ResNet-18 shapes)
# ---------------------------------------------------------------------------
def _make_bn_raw(key, c):
    k1, k2, k3, k4 = jax.random.split(key, 4)
    return dict(
        gamma=jax.random.uniform(k1, (c,), jnp.float32, 0.5, 1.5),
        beta=0.1 * jax.random.normal(k2, (c,), jnp.float32),
        mean=0.1 * jax.random.normal(k3, (c,), jnp.float32),
        var=jax.random.uniform(k4, (c,), jnp.float32, 0.5, 1.5),
    )


def _make_conv_raw(key, cout, cin, kh, kw):
    fan_out = kh * kw * cout                       # kaiming_normal_ mode='fan_out'
    std = (2.0 / fan_out) ** 0.5
    return std * jax.random.normal(key, (cout, cin, kh, kw), jnp.float32)


def _cpad(c):
    return ((c + _LANE - 1) // _LANE) * _LANE


def _prep_conv(w, cin_p, cout_p):
    cout, cin, kh, kw = w.shape
    wt = jnp.transpose(w, (2, 3, 1, 0)).reshape(kh * kw, cin, cout)    # tap-major (T,Cin,Cout)
    wt = jnp.pad(wt, ((0, 0), (0, cin_p - cin), (0, cout_p - cout)))   # lane-pad channels
    return wt.astype(jnp.bfloat16)


def _prep_stem_conv(w, cout_p):
    """7x7 stem weight, folded to a (1, K_pad, Cout_pad) matmul rhs with K = kh*kw*cin."""
    cout, cin, kh, kw = w.shape
    k = kh * kw * cin
    k_pad = _cpad(k)
    wm = jnp.transpose(w, (2, 3, 1, 0)).reshape(k, cout)               # (i,j,c) major -> K
    wm = jnp.pad(wm, ((0, k_pad - k), (0, cout_p - cout)))
    return wm.reshape(1, k_pad, cout_p).astype(jnp.bfloat16)


def _prep_bn(bn, cout_p):
    scale = bn["gamma"] * jax.lax.rsqrt(bn["var"] + _BN_EPS)
    bias = bn["beta"] - bn["mean"] * scale
    c = scale.shape[0]
    scale = jnp.pad(scale, (0, cout_p - c)).reshape(1, cout_p).astype(jnp.float32)
    bias = jnp.pad(bias, (0, cout_p - c)).reshape(1, cout_p).astype(jnp.float32)
    return scale, bias


def make_resnet18_params(key, num_classes):
    keys = iter(jax.random.split(key, 256))
    nk = lambda: next(keys)
    params = {}
    params["conv1_w"] = _prep_stem_conv(_make_conv_raw(nk(), 64, 3, 7, 7), _cpad(64))
    params["conv1_s"], params["conv1_b"] = _prep_bn(_make_bn_raw(nk(), 64), _cpad(64))
    cfg = [(64, 64, 1), (64, 128, 2), (128, 256, 2), (256, 512, 2)]
    for li, (cin, cout, stride) in enumerate(cfg, start=1):
        blocks = []
        for bi in range(2):
            s = stride if bi == 0 else 1
            in_c = cin if bi == 0 else cout
            blk = {
                "conv1_w": _prep_conv(_make_conv_raw(nk(), cout, in_c, 3, 3),
                                      _cpad(in_c), _cpad(cout)),
                "conv2_w": _prep_conv(_make_conv_raw(nk(), cout, cout, 3, 3),
                                      _cpad(cout), _cpad(cout)),
            }
            blk["bn1_s"], blk["bn1_b"] = _prep_bn(_make_bn_raw(nk(), cout), _cpad(cout))
            blk["bn2_s"], blk["bn2_b"] = _prep_bn(_make_bn_raw(nk(), cout), _cpad(cout))
            if s != 1 or in_c != cout:
                blk["down_w"] = _prep_conv(_make_conv_raw(nk(), cout, in_c, 1, 1),
                                           _cpad(in_c), _cpad(cout))
                blk["down_s"], blk["down_b"] = _prep_bn(_make_bn_raw(nk(), cout), _cpad(cout))
            blocks.append(blk)
        params[f"layer{li}"] = blocks
    ncp = _cpad(num_classes)
    fcw = 0.01 * jax.random.normal(nk(), (num_classes, 512), jnp.float32)
    params["fc_w"] = jnp.pad(jnp.transpose(fcw), ((0, 0), (0, ncp - num_classes)))
    params["fc_b"] = jnp.zeros((1, ncp), jnp.float32)
    return params


if __name__ == "__main__":
    key = jax.random.PRNGKey(0)
    kp, kx = jax.random.split(key)
    num_classes = 10
    params = make_resnet18_params(kp, num_classes=num_classes)
    # NCHW input (PyTorch convention): batch=2, channels=3, 64x64 spatial.
    x = jax.random.normal(kx, (2, 3, 64, 64), jnp.float32)

    # --- check 1: im2col stem (7x7 / s2, fused BN+ReLU) vs lax.conv reference ---
    xw = jnp.transpose(x, (0, 2, 3, 1)).astype(jnp.bfloat16)
    stem = stem_conv_bn(xw, params["conv1_w"], params["conv1_s"], params["conv1_b"], stride=2)
    w_hwio = params["conv1_w"][0, :7 * 7 * 3, :64].astype(jnp.float32).reshape(7, 7, 3, 64)
    ref1 = jax.lax.conv_general_dilated(
        xw.astype(jnp.float32), w_hwio, window_strides=(2, 2),
        padding=((3, 3), (3, 3)), dimension_numbers=("NHWC", "HWIO", "NHWC"),
        precision=jax.lax.Precision.HIGHEST)
    ref1 = jnp.maximum(ref1 * params["conv1_s"][0, :64].reshape(1, 1, 1, -1)
                       + params["conv1_b"][0, :64].reshape(1, 1, 1, -1), 0.0)
    assert np.allclose(np.asarray(stem[..., :64].astype(jnp.float32)), np.asarray(ref1),
                       rtol=0.1, atol=0.1)

    # --- check 2: generic fused conv (3x3 / s2, BN + residual + ReLU, chunked accum) ---
    kc1, kc2, kc3, kc4 = jax.random.split(kx, 4)
    xt = jax.random.normal(kc1, (1, 16, 16, 128), jnp.float32).astype(jnp.bfloat16)
    wt = _prep_conv(_make_conv_raw(kc2, 128, 128, 3, 3), 128, 128)
    sct, bit = _prep_bn(_make_bn_raw(kc3, 128), 128)
    rest = jax.random.normal(kc4, (1, 8, 8, 128), jnp.float32).astype(jnp.bfloat16)
    got = conv_bn(xt, wt, sct, bit, kh=3, kw=3, stride=2, pad=1, relu=True, residual=rest)
    w_hwio2 = wt.reshape(3, 3, 128, 128).astype(jnp.float32)
    ref2 = jax.lax.conv_general_dilated(
        xt.astype(jnp.float32), w_hwio2, window_strides=(2, 2),
        padding=((1, 1), (1, 1)), dimension_numbers=("NHWC", "HWIO", "NHWC"),
        precision=jax.lax.Precision.HIGHEST)
    ref2 = jnp.maximum(ref2 * sct.reshape(1, 1, 1, -1) + bit.reshape(1, 1, 1, -1)
                       + rest.astype(jnp.float32), 0.0)
    assert np.allclose(np.asarray(got.astype(jnp.float32)), np.asarray(ref2),
                       rtol=0.1, atol=0.1)

    # --- full forward pass ---
    fwd = jax.jit(resnet_forward, static_argnames=("num_classes", "stride_cfg"))
    out = fwd(x, params, num_classes=num_classes, stride_cfg=32)
    out = jax.block_until_ready(out)
    assert out.shape == (2, num_classes)
    assert bool(jnp.all(jnp.isfinite(out)))
    print("KERNEL_OK")
</pallas_src>

<mosaic_0001>
module attributes {stable_mosaic.version = 11 : i64} {
  func.func @_conv_bn_kernel(%arg0: i32, %arg1: i32, %arg2: memref<1x1x1056x256xbf16, #tpu.memory_space<vmem>>, %arg3: memref<1x256x128xbf16, #tpu.memory_space<vmem>>, %arg4: memref<1x128xf32, #tpu.memory_space<vmem>>, %arg5: memref<1x128xf32, #tpu.memory_space<vmem>>, %arg6: memref<1x1024x128xbf16, #tpu.memory_space<vmem>>) attributes {dimension_semantics = [#tpu.dimension_semantics<parallel>, #tpu.dimension_semantics<parallel>], iteration_bounds = array<i64: 2, 1>, scalar_prefetch = 0 : i64, scratch_operands = 0 : i64, tpu.core_type = #tpu.core_type<tc>, window_params = [{transform_indices = @transform_0, window_bounds = array<i64: 1, 1, 1056, 256>}, {transform_indices = @transform_1, window_bounds = array<i64: 1, 256, 128>}, {transform_indices = @transform_2, window_bounds = array<i64: 1, 128>}, {transform_indices = @transform_3, window_bounds = array<i64: 1, 128>}, {transform_indices = @transform_4, window_bounds = array<i64: 1, 1024, 128>}]} {
    %c0 = arith.constant 0 : index
    %c0_0 = arith.constant 0 : index
    %0 = vector.load %arg4[%c0, %c0_0] : memref<1x128xf32, #tpu.memory_space<vmem>>, vector<1x128xf32>
    %c0_1 = arith.constant 0 : index
    %c0_2 = arith.constant 0 : index
    %1 = vector.load %arg5[%c0_1, %c0_2] : memref<1x128xf32, #tpu.memory_space<vmem>>, vector<1x128xf32>
    %c0_3 = arith.constant 0 : index
    %c0_4 = arith.constant 0 : index
    %c0_5 = arith.constant 0 : index
    %c0_6 = arith.constant 0 : index
    %2 = vector.load %arg2[%c0_3, %c0_4, %c0_5, %c0_6] : memref<1x1x1056x256xbf16, #tpu.memory_space<vmem>>, vector<1x1x256x256xbf16>
    %3 = vector.shape_cast %2 : vector<1x1x256x256xbf16> to vector<256x256xbf16>
    %c0_7 = arith.constant 0 : index
    %c0_8 = arith.constant 0 : index
    %c0_9 = arith.constant 0 : index
    %4 = vector.load %arg3[%c0_7, %c0_8, %c0_9] : memref<1x256x128xbf16, #tpu.memory_space<vmem>>, vector<1x256x128xbf16>
    %5 = vector.shape_cast %4 : vector<1x256x128xbf16> to vector<256x128xbf16>
    %cst = arith.constant dense<0.000000e+00> : vector<256x128xf32>
    %6 = tpu.matmul %3, %5, %cst {dimension_numbers = #tpu.dot_dimension_numbers<[1], [0], [0], [1], [0, 0, 1, 1], [], []>} : vector<256x256xbf16>, vector<256x128xbf16>, vector<256x128xf32> -> vector<256x128xf32>
    %7 = vector.broadcast %0 : vector<1x128xf32> to vector<256x128xf32>
    %8 = arith.mulf %6, %7 : vector<256x128xf32>
    %9 = vector.broadcast %1 : vector<1x128xf32> to vector<256x128xf32>
    %10 = arith.addf %8, %9 : vector<256x128xf32>
    %cst_10 = arith.constant 0.000000e+00 : f32
    %11 = vector.broadcast %cst_10 : f32 to vector<256x128xf32>
    %12 = arith.maximumf %10, %11 : vector<256x128xf32>
    %13 = arith.truncf %12 : vector<256x128xf32> to vector<256x128xbf16>
    %c0_11 = arith.constant 0 : index
    %c0_12 = arith.constant 0 : index
    %c0_13 = arith.constant 0 : index
    %14 = vector.load %arg6[%c0_11, %c0_12, %c0_13] : memref<1x1024x128xbf16, #tpu.memory_space<vmem>>, vector<1x256x128xbf16>
    %15 = vector.shape_cast %14 : vector<1x256x128xbf16> to vector<256x128xbf16>
    %16 = vector.shape_cast %13 : vector<256x128xbf16> to vector<1x256x128xbf16>
    tpu.vector_store %arg6[%c0_11, %c0_12, %c0_13], %16 {strides = array<i32>} : memref<1x1024x128xbf16, #tpu.memory_space<vmem>>, vector<1x256x128xbf16>,
    %c0_14 = arith.constant 0 : index
    %c0_15 = arith.constant 0 : index
    %c256 = arith.constant 256 : index
    %c0_16 = arith.constant 0 : index
    %17 = vector.load %arg2[%c0_14, %c0_15, %c256, %c0_16] : memref<1x1x1056x256xbf16, #tpu.memory_space<vmem>>, vector<1x1x256x256xbf16>
    %18 = vector.shape_cast %17 : vector<1x1x256x256xbf16> to vector<256x256xbf16>
    %c0_17 = arith.constant 0 : index
    %c0_18 = arith.constant 0 : index
    %c0_19 = arith.constant 0 : index
    %19 = vector.load %arg3[%c0_17, %c0_18, %c0_19] : memref<1x256x128xbf16, #tpu.memory_space<vmem>>, vector<1x256x128xbf16>
    %20 = vector.shape_cast %19 : vector<1x256x128xbf16> to vector<256x128xbf16>
    %cst_20 = arith.constant dense<0.000000e+00> : vector<256x128xf32>
    %21 = tpu.matmul %18, %20, %cst_20 {dimension_numbers = #tpu.dot_dimension_numbers<[1], [0], [0], [1], [0, 0, 1, 1], [], []>} : vector<256x256xbf16>, vector<256x128xbf16>, vector<256x128xf32> -> vector<256x128xf32>
    %22 = vector.broadcast %0 : vector<1x128xf32> to vector<256x128xf32>
    %23 = arith.mulf %21, %22 : vector<256x128xf32>
    %24 = vector.broadcast %1 : vector<1x128xf32> to vector<256x128xf32>
    %25 = arith.addf %23, %24 : vector<256x128xf32>
    %cst_21 = arith.constant 0.000000e+00 : f32
    %26 = vector.broadcast %cst_21 : f32 to vector<256x128xf32>
    %27 = arith.maximumf %25, %26 : vector<256x128xf32>
    %28 = arith.truncf %27 : vector<256x128xf32> to vector<256x128xbf16>
    %c0_22 = arith.constant 0 : index
    %c256_23 = arith.constant 256 : index
    %c0_24 = arith.constant 0 : index
    %29 = vector.load %arg6[%c0_22, %c256_23, %c0_24] : memref<1x1024x128xbf16, #tpu.memory_space<vmem>>, vector<1x256x128xbf16>
    %30 = vector.shape_cast %29 : vector<1x256x128xbf16> to vector<256x128xbf16>
    %31 = vector.shape_cast %28 : vector<256x128xbf16> to vector<1x256x128xbf16>
    tpu.vector_store %arg6[%c0_22, %c256_23, %c0_24], %31 {strides = array<i32>} : memref<1x1024x128xbf16, #tpu.memory_space<vmem>>, vector<1x256x128xbf16>,
    %c0_25 = arith.constant 0 : index
    %c0_26 = arith.constant 0 : index
    %c512 = arith.constant 512 : index
    %c0_27 = arith.constant 0 : index
    %32 = vector.load %arg2[%c0_25, %c0_26, %c512, %c0_27] : memref<1x1x1056x256xbf16, #tpu.memory_space<vmem>>, vector<1x1x256x256xbf16>
    %33 = vector.shape_cast %32 : vector<1x1x256x256xbf16> to vector<256x256xbf16>
    %c0_28 = arith.constant 0 : index
    %c0_29 = arith.constant 0 : index
    %c0_30 = arith.constant 0 : index
    %34 = vector.load %arg3[%c0_28, %c0_29, %c0_30] : memref<1x256x128xbf16, #tpu.memory_space<vmem>>, vector<1x256x128xbf16>
    %35 = vector.shape_cast %34 : vector<1x256x128xbf16> to vector<256x128xbf16>
    %cst_31 = arith.constant dense<0.000000e+00> : vector<256x128xf32>
    %36 = tpu.matmul %33, %35, %cst_31 {dimension_numbers = #tpu.dot_dimension_numbers<[1], [0], [0], [1], [0, 0, 1, 1], [], []>} : vector<256x256xbf16>, vector<256x128xbf16>, vector<256x128xf32> -> vector<256x128xf32>
    %37 = vector.broadcast %0 : vector<1x128xf32> to vector<256x128xf32>
    %38 = arith.mulf %36, %37 : vector<256x128xf32>
    %39 = vector.broadcast %1 : vector<1x128xf32> to vector<256x128xf32>
    %40 = arith.addf %38, %39 : vector<256x128xf32>
    %cst_32 = arith.constant 0.000000e+00 : f32
    %41 = vector.broadcast %cst_32 : f32 to vector<256x128xf32>
    %42 = arith.maximumf %40, %41 : vector<256x128xf32>
    %43 = arith.truncf %42 : vector<256x128xf32> to vector<256x128xbf16>
    %c0_33 = arith.constant 0 : index
    %c512_34 = arith.constant 512 : index
    %c0_35 = arith.constant 0 : index
    %44 = vector.load %arg6[%c0_33, %c512_34, %c0_35] : memref<1x1024x128xbf16, #tpu.memory_space<vmem>>, vector<1x256x128xbf16>
    %45 = vector.shape_cast %44 : vector<1x256x128xbf16> to vector<256x128xbf16>
    %46 = vector.shape_cast %43 : vector<256x128xbf16> to vector<1x256x128xbf16>
    tpu.vector_store %arg6[%c0_33, %c512_34, %c0_35], %46 {strides = array<i32>} : memref<1x1024x128xbf16, #tpu.memory_space<vmem>>, vector<1x256x128xbf16>,
    %c0_36 = arith.constant 0 : index
    %c0_37 = arith.constant 0 : index
    %c768 = arith.constant 768 : index
    %c0_38 = arith.constant 0 : index
    %47 = vector.load %arg2[%c0_36, %c0_37, %c768, %c0_38] : memref<1x1x1056x256xbf16, #tpu.memory_space<vmem>>, vector<1x1x256x256xbf16>
    %48 = vector.shape_cast %47 : vector<1x1x256x256xbf16> to vector<256x256xbf16>
    %c0_39 = arith.constant 0 : index
    %c0_40 = arith.constant 0 : index
    %c0_41 = arith.constant 0 : index
    %49 = vector.load %arg3[%c0_39, %c0_40, %c0_41] : memref<1x256x128xbf16, #tpu.memory_space<vmem>>, vector<1x256x128xbf16>
    %50 = vector.shape_cast %49 : vector<1x256x128xbf16> to vector<256x128xbf16>
    %cst_42 = arith.constant dense<0.000000e+00> : vector<256x128xf32>
    %51 = tpu.matmul %48, %50, %cst_42 {dimension_numbers = #tpu.dot_dimension_numbers<[1], [0], [0], [1], [0, 0, 1, 1], [], []>} : vector<256x256xbf16>, vector<256x128xbf16>, vector<256x128xf32> -> vector<256x128xf32>
    %52 = vector.broadcast %0 : vector<1x128xf32> to vector<256x128xf32>
    %53 = arith.mulf %51, %52 : vector<256x128xf32>
    %54 = vector.broadcast %1 : vector<1x128xf32> to vector<256x128xf32>
    %55 = arith.addf %53, %54 : vector<256x128xf32>
    %cst_43 = arith.constant 0.000000e+00 : f32
    %56 = vector.broadcast %cst_43 : f32 to vector<256x128xf32>
    %57 = arith.maximumf %55, %56 : vector<256x128xf32>
    %58 = arith.truncf %57 : vector<256x128xf32> to vector<256x128xbf16>
    %c0_44 = arith.constant 0 : index
    %c768_45 = arith.constant 768 : index
    %c0_46 = arith.constant 0 : index
    %59 = vector.load %arg6[%c0_44, %c768_45, %c0_46] : memref<1x1024x128xbf16, #tpu.memory_space<vmem>>, vector<1x256x128xbf16>
    %60 = vector.shape_cast %59 : vector<1x256x128xbf16> to vector<256x128xbf16>
    %61 = vector.shape_cast %58 : vector<256x128xbf16> to vector<1x256x128xbf16>
    tpu.vector_store %arg6[%c0_44, %c768_45, %c0_46], %61 {strides = array<i32>} : memref<1x1024x128xbf16, #tpu.memory_space<vmem>>, vector<1x256x128xbf16>,
    return
  }
  func.func @transform_0(%arg0: i32, %arg1: i32) -> (i32, i32, i32, i32) {
    %c0_i32 = arith.constant 0 : i32
    %c0_i32_0 = arith.constant 0 : i32
    %c0_i32_1 = arith.constant 0 : i32
    %c0_i32_2 = arith.constant 0 : i32
    return %arg0, %c0_i32, %c0_i32_0, %c0_i32_1 : i32, i32, i32, i32
  }
  func.func @transform_1(%arg0: i32, %arg1: i32) -> (i32, i32, i32) {
    %c0_i32 = arith.constant 0 : i32
    %c0_i32_0 = arith.constant 0 : i32
    %c0_i32_1 = arith.constant 0 : i32
    return %c0_i32, %c0_i32_0, %arg1 : i32, i32, i32
  }
  func.func @transform_2(%arg0: i32, %arg1: i32) -> (i32, i32) {
    %c0_i32 = arith.constant 0 : i32
    %c0_i32_0 = arith.constant 0 : i32
    return %c0_i32, %arg1 : i32, i32
  }
  func.func @transform_3(%arg0: i32, %arg1: i32) -> (i32, i32) {
    %c0_i32 = arith.constant 0 : i32
    %c0_i32_0 = arith.constant 0 : i32
    return %c0_i32, %arg1 : i32, i32
  }
  func.func @transform_4(%arg0: i32, %arg1: i32) -> (i32, i32, i32) {
    %c0_i32 = arith.constant 0 : i32
    %c0_i32_0 = arith.constant 0 : i32
    return %arg0, %c0_i32, %arg1 : i32, i32, i32
  }
}

</mosaic_0001>

<bundles_post_ra>
// kernel: tpu_custom_call.1
= control target key start
LH: loop header
LB: loop body
LE: loop exit
PB: predicated region body
PF: predicated region fallthrough
CT: control target
= control target key end

     0   :  { %s5939_s0 = inlined_call_operand.hbm [shape: bf16[2,1,1056,256], index: 0, kind: input, shape index: {}]   ;;  %s5940_s1 = inlined_call_operand.hbm [shape: bf16[1,256,128], index: 1, kind: input, shape index: {}]   ;;  %s5941_s2 = inlined_call_operand.hbm [shape: f32[1,128], index: 2, kind: input, shape index: {}]   ;;  %s5942_s3 = inlined_call_operand.hbm [shape: f32[1,128], index: 3, kind: input, shape index: {}]   ;;  %s5943_s4 = inlined_call_operand.hbm [shape: bf16[2,1024,128], index: 4, kind: output, shape index: {}]  }
   0x1   :  { %5947 = sst [smem:[#allocation15_spill]] %s5940_s1 }
   0x2   :  { %5948 = sst [smem:[#allocation16_spill]] %s5941_s2 }
   0x3   :  { %9 = vsyncpa [#allocation3], 0 }
   0x4   :  { %11 = vsyncpa [#allocation3 + $0x1], 0 }
   0x5   :  { %12 = vsyncpa [#allocation6], 0 }
   0x6   :  { %13 = vsyncpa [#allocation9], 0 }
   0x7   :  { %14 = vsyncpa [#allocation4], 0 }
   0x8   :  { %16 = vsyncpa [#allocation4 + $0x1], 0  ;;  %s5279_s15 = smov 0   ;;  %s5281_s16 = smov 0  }
   0x9   :  { %s5283_s17 = smov 0   ;;  %s5285_s18 = smov 0  }
   0xa   :  { %s5287_s19 = smov 0   ;;  %s5289_s20 = smov 0  }
   0xb LB: > { %s3387_s21 = sadd.s32 4294967295, %s5241_s20   ;;  %s3388_s22 = sadd.s32 4294967294, %s5241_s20   ;;  %s5241_s20 = sphi %s5289_s20, %s22_s20   ;;  %s5237_s19 = sphi %s5287_s19, %s5967_s19   ;;  %s5233_s18 = sphi %s5285_s18, %s5966_s18   ;;  %s5229_s17 = sphi %s5283_s17, %s5965_s17   ;;  %s5225_s16 = sphi %s5281_s16, %s5964_s16   ;;  %s5221_s15 = sphi %s5279_s15, %s5963_s15  }
   0xc   : > { %p54_p0 = scmp.ne.s32.totalorder %s5225_s16, %s5221_s15  ;;  %p5313_p1 = scmp.eq.s32.totalorder %s3387_s21, 0 }
   0xd   : > { %p5317_p2 = scmp.eq.s32.totalorder %s3387_s21, 1  ;;  %p164_p3 = scmp.eq.s32.totalorder %s3388_s22, 1 }
   0xe   : > { %s5949_s23 = scalar_select %p5313_p1, 1, 0 }
   0xf   : > { %p5323_p4 = por %p5313_p1, %p54_p0  ;;  %p3389_p5 = scmp.ge.s32.totalorder %s5241_s20, 1 }
  0x10   : > { %p5328_p6 = por %p164_p3, %p54_p0  ;;  %p171_p7 = scmp.lt.s32.totalorder %s5241_s20, 3 }
  0x11   : > { %s5951_s25 = scalar_select %p5323_p4, 1, 0 }
  0x12   : > { %s5952_s26 = scalar_select %p5328_p6, 1, 0 }
  0x13   : > { %p5333_p8 = pnand %p3389_p5, %p171_p7  ;;  %s5243_s28 = smov [#allocation5]  }
  0x14   : > { %s185_s29 = sshll.u32 %s5243_s28, 4  ;;  %s5244_s5 = smov [#allocation7]   ;;  %s186_s29 = int_to_ptr.vmem [resolvable:$true] %s185_s29 }
  0x15   : > { %p4706_p9 = pneg %p5333_p8  ;;  %s201_s6 = sshll.u32 %s5244_s5, 4  ;;  %s202_s6 = int_to_ptr.vmem [resolvable:$true] %s201_s6 }
  0x16   : > { %s5245_s7 = smov [#allocation8]   ;;  %s5058_s9 = scalar_lea.vmem %s186_s29, 2048 }
  0x17   : > { %p5342_p11 = pnand %p4706_p9, %p5313_p1  ;;  %s214_s8 = sshll.u32 %s5245_s7, 4  ;;  %s215_s8 = int_to_ptr.vmem [resolvable:$true] %s214_s8 }
  0x18   : > { %p5059_p13 = scmp.ne.s32.totalorder %s186_s29, %s5058_s9  ;;  %p5066_p5 = scmp.lt.s32.totalorder %s186_s29, %s186_s29 }
  0x19   : > { %p5049_p12 = pneg %p5342_p11  ;;  %p5067_p7 = scmp.lt.s32.totalorder %s5058_s9, %s5058_s9 }
  0x1b   : > { %p5061_p0 = pnand %p5059_p13, %p5049_p12  ;;  %p5068_p9 = por %p5067_p7, %p5066_p5 }
  0x1d   : > { %p5062_p3 = pneg %p5061_p0 }
  0x1f   : > { %p5069_p10 = pnand %p5068_p9, %p5062_p3 }
  0x21   : > { %5072 = shalt.err (!%p5069_p10)
}
  0x22   : > { %s5246_s10 = smov 64   ;;  %s5247_s11 = smov 4  }
  0x23   : > { %s5955_s1 = sld [smem:[#allocation15_spill]]  ;;  %s5084_s14 = scalar_lea.vmem %s202_s6, 16 }
  0x24   : > { %p5085_p6 = scmp.ne.s32.totalorder %s202_s6, %s5084_s14  ;;  %s5091_s21 = scalar_lea.vmem %s202_s6, 32 }
  0x25   : > { %p5092_p1 = scmp.lt.s32.totalorder %s202_s6, %s202_s6  ;;  %p5093_p5 = scmp.lt.s32.totalorder %s5091_s21, %s5084_s14 }
  0x26   : > { %p5087_p13 = pnand %p5085_p6, %p5049_p12 }
  0x27   : > { %p5094_p3 = por %p5093_p5, %p5092_p1 }
  0x28   : > { %p5088_p0 = pneg %p5087_p13 }
  0x29   : > { %4709 = dma.hbm_to_vmem [thread:$0]  (!%p5342_p11), %s5955_s1, 2048, %s186_s29, [#allocation6], %s5246_s10, %s5246_s10, %s5247_s11  }
  0x2a   : > { %p5095_p10 = pnand %p5094_p3, %p5088_p0 }
  0x2c   : > { %5098 = shalt.err (!%p5095_p10)
}
  0x2d   : > { %s5956_s2 = sld [smem:[#allocation16_spill]]  ;;  %s5110_s29 = scalar_lea.vmem %s215_s8, 16 }
  0x2e   : > { %p5111_p7 = scmp.ne.s32.totalorder %s215_s8, %s5110_s29  ;;  %s5117_s5 = scalar_lea.vmem %s215_s8, 32 }
  0x2f   : > { %p5118_p13 = scmp.lt.s32.totalorder %s215_s8, %s215_s8  ;;  %p5119_p4 = scmp.lt.s32.totalorder %s5117_s5, %s5110_s29 }
  0x30   : > { %p5113_p6 = pnand %p5111_p7, %p5049_p12 }
  0x31   : > { %p5120_p1 = por %p5119_p4, %p5118_p13 }
  0x32   : > { %p5114_p9 = pneg %p5113_p6 }
  0x33   : > { %4712 = dma.hbm_to_vmem [thread:$0]  (!%p5342_p11), %s5956_s2, 16, %s202_s6, [#allocation6]  }
  0x34   : > { %p5121_p0 = pnand %p5120_p1, %p5114_p9 }
  0x36   : > { %5124 = shalt.err (!%p5121_p0)
}
  0x37   : > { %4715 = dma.hbm_to_vmem [thread:$0]  (!%p5342_p11), %s5942_s3, 16, %s215_s8, [#allocation9]  }
  0x38   : > { %s41_s6 = sadd.s32 1, %s5229_s17  ;;  %s34_s10 = sadd.s32 1, %s5237_s19 }
  0x39   : > { %p48_p4 = scmp.ne.s32.totalorder %s5229_s17, %s5225_s16  ;;  %p36_p12 = scmp.ge.s32.totalorder %s34_s10, 2 }
  0x3a   : > { %p49_p5 = scmp.eq.s32.totalorder %s5241_s20, 0  ;;  %p4727_p10 = scmp.lt.s32.totalorder %s5241_s20, 2 }
  0x3b   : > { %p5379_p3 = por %p5317_p2, %p48_p4  ;;  %s5969_s10 = smov (%p36_p12, %s34_s10), 0 }
  0x3c   : > { %p50_p7 = por %p49_p5, %p48_p4  ;;  %s225_s11 = sand.u32 1, %s5229_s17  }
  0x3d   : > { %s38_s12 = ssub.s32 %s5237_s19, %s5969_s10  ;;  %s4687_s8 = smul.u32 1056, %s225_s11 }
  0x3e   : > { %p39_p6 = scmp.eq.s32.totalorder %s38_s12, 0  ;;  %s4688_s13 = smul.u32 16896, %s5237_s19 }
  0x3f   : > { %p5390_p11 = pnand %p4727_p10, %p50_p7  ;;  %s229_s29 = scalar_lea.vmem [#allocation2], %s4687_s8 }
  0x40   : > { %s5395_s24 = scalar_select %p39_p6, %s5229_s17, %s41_s6  }
  0x41   : > { %s235_s28 = scalar_lea.hbm %s5939_s0, %s4688_s13  ;;  %s236_s5 = sshll.u32 %s229_s29, 4  ;;  %s237_s5 = int_to_ptr.vmem [resolvable:$true] %s236_s5 }
  0x42   : > { %s226_s7 = scalar_lea.sflag [#allocation3], %s225_s11  ;;  %p5127_p2 = pneg %p5390_p11 }
  0x43   : > { %s5138_s9 = scalar_lea.vmem %s237_s5, 16896  ;;  %s5248_s12 = smov [#allocation2]  }
  0x44   : > { %p5139_p9 = scmp.ne.s32.totalorder %s237_s5, %s5138_s9  ;;  %s5143_s1 = sshll.u32 %s5248_s12, 4  ;;  %s5144_s1 = int_to_ptr.vmem [resolvable:$false] %s5143_s1 }
  0x45   : > { %s5145_s2 = scalar_lea.vmem %s5144_s1, 33792  ;;  %p5146_p0 = scmp.lt.s32.totalorder %s237_s5, %s5144_s1 }
  0x46   : > { %p5141_p13 = pnand %p5139_p9, %p5127_p2  ;;  %p5147_p4 = scmp.lt.s32.totalorder %s5145_s2, %s5138_s9 }
  0x48   : > { %p5142_p1 = pneg %p5141_p13  ;;  %p5148_p12 = por %p5147_p4, %p5146_p0 }
  0x4a   : > { %p5149_p5 = pnand %p5148_p12, %p5142_p1 }
  0x4c   : > { %5152 = shalt.err (!%p5149_p5)
}
  0x4d   : > { %s5249_s6 = smov 128   ;;  %s5250_s8 = smov 8  }
  0x4e   : > { %4719 = dma.hbm_to_vmem [thread:$0]  (!%p5390_p11), %s235_s28, 16896, %s237_s5, %s226_s7, %s5249_s6, %s5249_s6, %s5250_s8  }
  0x4f   : > { %248 = sbr.rel (%p5333_p8) target bundleno = 596 (0x254), region = 36  ;;  %s5407_s11 = sand.u32 (!%p5333_p8), 1, %s5225_s16  }
  0x50   : > { %s4689_s13 = smul.u32 (!%p5333_p8), 1056, %s5407_s11  ;;  %s251_s1 = scalar_lea.sflag (!%p5333_p8), [#allocation3], %s5407_s11 }
  0x51   : > { %p5959_p10 = scmp.ne.s32.totalorder (!%p5333_p8), %s5951_s25, 0 }
  0x52   : > { %s5411_s2 = scalar_lea.vmem (!%p5333_p8), [#allocation2], %s4689_s13 }
  0x54   : > { %5204 = dma.done.wait (%p5959_p10), %s251_s1, 16896  }
  0x55   : > { %5206 = vsyncadd (%p5959_p10), %s251_s1, 4294950400  ;;  %p5960_p7 = scmp.ne.s32.totalorder %s5949_s23, 0 }
  0x57   : > { %5208 = dma.done.wait (%p5960_p7), [#allocation6], 2064  }
  0x58   : > { %5210 = vsyncadd (%p5960_p7), [#allocation6], 4294965232 }
  0x59   : > { %5212 = dma.done.wait (%p5960_p7), [#allocation9], 16  }
  0x5a   : > { %5214 = vsyncadd (%p5960_p7), [#allocation9], 4294967280  ;;  %v4789_v0 = vld [vmem:[#allocation5 + $0x78] sm:$0xff]   ;;  %v4793_v4 = vld [vmem:[#allocation5 + $0x70] sm:$0xff]   ;;  %s3399_s23 = sshll.u32 %s5407_s11, 9  ;;  %s3855_s27 = sshll.u32 %s5233_s18, 13 }
  0x5b   : > { %v4790_v1 = vld [vmem:[#allocation5 + $0x78] sm:$0xff]   ;;  %4239 = vmatprep.subr.bf16.mxu0 %v4789_v0  ;;  %v4794_v5 = vld [vmem:[#allocation5 + $0x70] sm:$0xff]   ;;  %v4797_v8 = vld [vmem:[#allocation5 + $0x68] sm:$0xff]   ;;  %s5550_s25 = scalar_lea.vmem [#allocation10], %s3399_s23  ;;  %s5887_s28 = scalar_lea.hbm %s5943_s4, %s3855_s27 }
  0x5c   : > { %v4791_v2 = vld [vmem:[#allocation5 + $0x38] sm:$0xff]   ;;  %4351 = vmatprep.subr.bf16.mxu1 %v4790_v1  ;;  %v4795_v6 = vld [vmem:[#allocation5 + $0x30] sm:$0xff]   ;;  %v4798_v9 = vld [vmem:[#allocation5 + $0x68] sm:$0xff]   ;;  %s3269_s14 = sshll.u32 %s5550_s25, 4  ;;  %s3255_s18 = scalar_lea.sflag [#allocation4], %s5407_s11  ;;  %s5889_s14 = int_to_ptr.vmem [resolvable:$true] %s3269_s14 }
  0x5d   : > { %v4792_v3 = vld [vmem:[#allocation5 + $0x38] sm:$0xff]   ;;  %4240 = vmatpush3.bf16.msra.mxu0 %v4791_v2  ;;  %v4796_v7 = vld [vmem:[#allocation5 + $0x30] sm:$0xff]   ;;  %v4799_v10 = vld [vmem:[#allocation5 + $0x28] sm:$0xff]   ;;  %s5153_s29 = scalar_lea.vmem %s5889_s14, 8192  ;;  %s5251_s5 = smov [#allocation10]  }
  0x5e   : > { %4352 = vmatpush3.bf16.msra.mxu1 %v4792_v3  ;;  %4241 = vmatprep.subr.bf16.mxu0 %v4793_v4  ;;  %v4800_v11 = vld [vmem:[#allocation5 + $0x28] sm:$0xff]   ;;  %v4801_v12 = vld [vmem:[#allocation5 + $0x60] sm:$0xff]   ;;  %v4805_v16 = vld [vmem:[#allocation5 + $0x58] sm:$0xff]   ;;  %p5154_p8 = scmp.ne.s32.totalorder %s5889_s14, %s5153_s29  ;;  %s5157_s7 = sshll.u32 %s5251_s5, 4  ;;  %s5158_s7 = int_to_ptr.vmem [resolvable:$false] %s5157_s7 }
  0x5f   : > { %4353 = vmatprep.subr.bf16.mxu1 %v4794_v5  ;;  %v4802_v13 = vld [vmem:[#allocation5 + $0x60] sm:$0xff]   ;;  %v4806_v17 = vld [vmem:[#allocation5 + $0x58] sm:$0xff]   ;;  %v4809_v20 = vld [vmem:[#allocation5 + $0x50] sm:$0xff]   ;;  %s5159_s9 = scalar_lea.vmem %s5158_s7, 16384  ;;  %p5160_p2 = scmp.lt.s32.totalorder %s5889_s14, %s5158_s7 }
  0x60   : > { %v4803_v14 = vld [vmem:[#allocation5 + $0x20] sm:$0xff]   ;;  %v4807_v18 = vld [vmem:[#allocation5 + $0x18] sm:$0xff]   ;;  %v4810_v21 = vld [vmem:[#allocation5 + $0x50] sm:$0xff]   ;;  %p5155_p6 = pnand %p5154_p8, %p5379_p3  ;;  %p5161_p9 = scmp.lt.s32.totalorder %s5159_s9, %s5153_s29 }
  0x61   : > { %4242 = vmatpush3.bf16.msra.mxu0 %v4795_v6  ;;  %v4804_v15 = vld [vmem:[#allocation5 + $0x20] sm:$0xff]   ;;  %v4808_v19 = vld [vmem:[#allocation5 + $0x18] sm:$0xff]   ;;  %v4811_v22 = vld [vmem:[#allocation5 + $0x10] sm:$0xff]  }
  0x62   : > { %4354 = vmatpush3.bf16.msra.mxu1 %v4796_v7  ;;  %4243 = vmatprep.subr.bf16.mxu0 %v4797_v8  ;;  %v4812_v23 = vld [vmem:[#allocation5 + $0x10] sm:$0xff]   ;;  %v4813_v24 = vld [vmem:[#allocation5 + $0x48] sm:$0xff]   ;;  %v4817_v28 = vld [vmem:[#allocation5 + $0x40] sm:$0xff]   ;;  %p5156_p11 = pneg %p5155_p6  ;;  %p5162_p13 = por %p5161_p9, %p5160_p2 }
  0x63   : > { %4355 = vmatprep.subr.bf16.mxu1 %v4798_v9  ;;  %v4814_v25 = vld [vmem:[#allocation5 + $0x48] sm:$0xff]   ;;  %v4818_v29 = vld [vmem:[#allocation5 + $0x40] sm:$0xff]   ;;  %v4827_v36 = vld [vmem:[#allocation5 + $0x78] sm:$0xff]  }
  0x64   : > { %v4815_v26 = vld [vmem:[#allocation5 + $0x8] sm:$0xff]   ;;  %v4819_v30 = vld [vmem:[#allocation5] sm:$0xff]   ;;  %v4828_v37 = vld [vmem:[#allocation5 + $0x78] sm:$0xff]   ;;  %p5163_p1 = pnand %p5162_p13, %p5156_p11 }
  0x65   : > { %4244 = vmatpush3.bf16.msra.mxu0 %v4799_v10  ;;  %v4816_v27 = vld [vmem:[#allocation5 + $0x8] sm:$0xff]   ;;  %v4820_v31 = vld [vmem:[#allocation5] sm:$0xff]   ;;  %v4829_v38 = vld [vmem:[#allocation5 + $0x38] sm:$0xff]  }
  0x66   : > { %4356 = vmatpush3.bf16.msra.mxu1 %v4800_v11  ;;  %4245 = vmatprep.subr.bf16.mxu0 %v4801_v12  ;;  %v4821_v32 = vld [vmem:[%s5411_s2] ss:$8 sps:$4 sm:$0xff]   ;;  %v4823_v33 = vld [vmem:[%s5411_s2 + $0x4] ss:$8 sps:$4 sm:$0xff]   ;;  %v4830_v39 = vld [vmem:[#allocation5 + $0x38] sm:$0xff]  }
  0x67   : > { %4357 = vmatprep.subr.bf16.mxu1 %v4802_v13  ;;  %v4824_v34 = vld [vmem:[%s5411_s2 + $0x100] ss:$8 sps:$4 sm:$0xff]   ;;  %v4826_v35 = vld [vmem:[%s5411_s2 + $0x104] ss:$8 sps:$4 sm:$0xff]   ;;  %646 = vmatprep.mubr.bf16.mxu0 %v4823_v33  ;;  %v4831_v40 = vld [vmem:[%s5411_s2 + $0x14] ss:$8 sps:$4 sm:$0xff]  }
  0x68   : > { %1395 = vmatprep.mubr.bf16.mxu1 %v4826_v35  ;;  %v4833_v41 = vld [vmem:[%s5411_s2 + $0x114] ss:$8 sps:$4 sm:$0xff]   ;;  %v4835_v42 = vld [vmem:[%s5411_s2 + $0x10] ss:$8 sps:$4 sm:$0xff]   ;;  %v4837_v44 = vld [vmem:[%s5411_s2 + $0x24] ss:$8 sps:$4 sm:$0xff]  }
  0x69   : > { %4246 = vmatpush3.bf16.msra.mxu0 %v4803_v14  ;;  %v4836_v43 = vld [vmem:[%s5411_s2 + $0x110] ss:$8 sps:$4 sm:$0xff]   ;;  %v4839_v45 = vld [vmem:[%s5411_s2 + $0x124] ss:$8 sps:$4 sm:$0xff]   ;;  %v4841_v48 = vld [vmem:[%s5411_s2 + $0x20] ss:$8 sps:$4 sm:$0xff]  }
  0x6a   : > { %4358 = vmatpush3.bf16.msra.mxu1 %v4804_v15  ;;  %4247 = vmatprep.subr.bf16.mxu0 %v4805_v16  ;;  %v4843_v46 = vld [vmem:[#allocation5 + $0x70] sm:$0xff]   ;;  %v4842_v51 = vld [vmem:[%s5411_s2 + $0x120] ss:$8 sps:$4 sm:$0xff]   ;;  %v4853_v57 = vld [vmem:[%s5411_s2 + $0x44] ss:$8 sps:$4 sm:$0xff]  }
  0x6b   : > { %4359 = vmatprep.subr.bf16.mxu1 %v4806_v17  ;;  %v4844_v47 = vld [vmem:[#allocation5 + $0x70] sm:$0xff]   ;;  %v4859_v55 = vld [vmem:[#allocation5 + $0x68] sm:$0xff]   ;;  %v4875_v1 = vld [vmem:[#allocation5 + $0x60] sm:$0xff]  }
  0x6c   : > { %v4845_v49 = vld [vmem:[#allocation5 + $0x30] sm:$0xff]   ;;  %v4860_v58 = vld [vmem:[#allocation5 + $0x68] sm:$0xff]   ;;  %v4876_v3 = vld [vmem:[#allocation5 + $0x60] sm:$0xff]  }
  0x6d   : > { %4248 = vmatpush3.bf16.msra.mxu0 %v4807_v18  ;;  %v4846_v50 = vld [vmem:[#allocation5 + $0x30] sm:$0xff]   ;;  %v4861_v59 = vld [vmem:[#allocation5 + $0x28] sm:$0xff]   ;;  %v4877_v4 = vld [vmem:[#allocation5 + $0x20] sm:$0xff]  }
  0x6e   : > { %4360 = vmatpush3.bf16.msra.mxu1 %v4808_v19  ;;  %4249 = vmatprep.subr.bf16.mxu0 %v4809_v20  ;;  %v4847_v52 = vld [vmem:[%s5411_s2 + $0x34] ss:$8 sps:$4 sm:$0xff]   ;;  %v4851_v54 = vld [vmem:[%s5411_s2 + $0x30] ss:$8 sps:$4 sm:$0xff]   ;;  %v4862_v60 = vld [vmem:[#allocation5 + $0x28] sm:$0xff]  }
  0x6f   : > { %4361 = vmatprep.subr.bf16.mxu1 %v4810_v21  ;;  %v4849_v53 = vld [vmem:[%s5411_s2 + $0x134] ss:$8 sps:$4 sm:$0xff]   ;;  %v4852_v56 = vld [vmem:[%s5411_s2 + $0x130] ss:$8 sps:$4 sm:$0xff]   ;;  %v4855_v61 = vld [vmem:[%s5411_s2 + $0x144] ss:$8 sps:$4 sm:$0xff]  }
  0x70   : > { %v4857_v62 = vld [vmem:[%s5411_s2 + $0x40] ss:$8 sps:$4 sm:$0xff]   ;;  %v4863_v0 = vld [vmem:[%s5411_s2 + $0x54] ss:$8 sps:$4 sm:$0xff]   ;;  %v4867_v6 = vld [vmem:[%s5411_s2 + $0x50] ss:$8 sps:$4 sm:$0xff]  }
  0x71   : > { %4250 = vmatpush3.bf16.msra.mxu0 %v4811_v22  ;;  %v4858_v63 = vld [vmem:[%s5411_s2 + $0x140] ss:$8 sps:$4 sm:$0xff]   ;;  %v4865_v2 = vld [vmem:[%s5411_s2 + $0x154] ss:$8 sps:$4 sm:$0xff]   ;;  %v4868_v7 = vld [vmem:[%s5411_s2 + $0x150] ss:$8 sps:$4 sm:$0xff]  }
  0x72   : > { %4362 = vmatpush3.bf16.msra.mxu1 %v4812_v23  ;;  %4251 = vmatprep.subr.bf16.mxu0 %v4813_v24  ;;  %v4878_v5 = vld [vmem:[#allocation5 + $0x20] sm:$0xff]   ;;  %v4891_v10 = vld [vmem:[#allocation5 + $0x58] sm:$0xff]   ;;  %v4907_v18 = vld [vmem:[#allocation5 + $0x50] sm:$0xff]  }
  0x73   : > { %4363 = vmatprep.subr.bf16.mxu1 %v4814_v25  ;;  %v4869_v8 = vld [vmem:[%s5411_s2 + $0x64] ss:$8 sps:$4 sm:$0xff]   ;;  %v4892_v11 = vld [vmem:[#allocation5 + $0x58] sm:$0xff]   ;;  %v4873_v14 = vld [vmem:[%s5411_s2 + $0x60] ss:$8 sps:$4 sm:$0xff]  }
  0x74   : > { %v4871_v9 = vld [vmem:[%s5411_s2 + $0x164] ss:$8 sps:$4 sm:$0xff]   ;;  %v4893_v12 = vld [vmem:[#allocation5 + $0x18] sm:$0xff]   ;;  %v4874_v15 = vld [vmem:[%s5411_s2 + $0x160] ss:$8 sps:$4 sm:$0xff]  }
  0x75   : > { %4252 = vmatpush3.bf16.msra.mxu0 %v4815_v26  ;;  %v4894_v13 = vld [vmem:[#allocation5 + $0x18] sm:$0xff]   ;;  %v4908_v19 = vld [vmem:[#allocation5 + $0x50] sm:$0xff]   ;;  %v4885_v24 = vld [vmem:[%s5411_s2 + $0x84] ss:$8 sps:$4 sm:$0xff]  }
  0x76   : > { %4364 = vmatpush3.bf16.msra.mxu1 %v4816_v27  ;;  %4253 = vmatprep.subr.bf16.mxu0 %v4817_v28  ;;  %v4879_v16 = vld [vmem:[%s5411_s2 + $0x74] ss:$8 sps:$4 sm:$0xff]   ;;  %v4883_v22 = vld [vmem:[%s5411_s2 + $0x70] ss:$8 sps:$4 sm:$0xff]   ;;  %v4887_v25 = vld [vmem:[%s5411_s2 + $0x184] ss:$8 sps:$4 sm:$0xff]  }
  0x77   : > { %4365 = vmatprep.subr.bf16.mxu1 %v4818_v29  ;;  %v4881_v17 = vld [vmem:[%s5411_s2 + $0x174] ss:$8 sps:$4 sm:$0xff]   ;;  %v4884_v23 = vld [vmem:[%s5411_s2 + $0x170] ss:$8 sps:$4 sm:$0xff]   ;;  %v4923_v26 = vld [vmem:[#allocation5 + $0x48] sm:$0xff]  }
  0x78   : > { %v4909_v20 = vld [vmem:[#allocation5 + $0x10] sm:$0xff]   ;;  %v4924_v27 = vld [vmem:[#allocation5 + $0x48] sm:$0xff]   ;;  %v4940_v35 = vld [vmem:[#allocation5 + $0x40] sm:$0xff]  }
  0x79   : > { %4254 = vmatpush3.bf16.msra.mxu0 %v4819_v30  ;;  %v4910_v21 = vld [vmem:[#allocation5 + $0x10] sm:$0xff]   ;;  %v4925_v28 = vld [vmem:[#allocation5 + $0x8] sm:$0xff]  }
  0x7a   : > { %4366 = vmatpush3.bf16.msra.mxu1 %v4820_v31  ;;  %4463 = vmatprep.subr.bf16.mxu0 %v4827_v36  ;;  %v4926_v29 = vld [vmem:[#allocation5 + $0x8] sm:$0xff]   ;;  %v4897_v33 = vld [vmem:[%s5411_s2 + $0x194] ss:$8 sps:$4 sm:$0xff]   ;;  %v4899_v36 = vld [vmem:[%s5411_s2 + $0x90] ss:$8 sps:$4 sm:$0xff]  }
  0x7b   : > { %4575 = vmatprep.subr.bf16.mxu1 %v4828_v37  ;;  %v4889_v30 = vld [vmem:[%s5411_s2 + $0x80] ss:$8 sps:$4 sm:$0xff]  }
  0x7c   : > { %647 = vmatmul.mubr.bf16.vlgmr.msra.gmra.mxu0 %v4821_v32  ;;  %v4890_v31 = vld [vmem:[%s5411_s2 + $0x180] ss:$8 sps:$4 sm:$0xff]   ;;  %v4895_v32 = vld [vmem:[%s5411_s2 + $0x94] ss:$8 sps:$4 sm:$0xff]  }
  0x7d   : > { %1396 = vmatmul.mubr.bf16.vlgmr.msra.gmra.mxu1 %v4824_v34  ;;  %4464 = vmatpush3.bf16.msra.mxu0 %v4829_v38  ;;  %v4939_v34 = vld [vmem:[#allocation5 + $0x40] sm:$0xff]  }
  0x7e   : > { %4576 = vmatpush3.bf16.msra.mxu1 %v4830_v39  ;;  %654 = vmatprep.mubr.bf16.mxu0 %v4831_v40  ;;  %v4941_v37 = vld [vmem:[#allocation5] sm:$0xff]   ;;  %v4900_v39 = vld [vmem:[%s5411_s2 + $0x190] ss:$8 sps:$4 sm:$0xff]  }
  0x7f   : > { %1403 = vmatprep.mubr.bf16.mxu1 %v4833_v41  ;;  %4465 = vmatprep.subr.bf16.mxu0 %v4843_v46  ;;  %v4942_v38 = vld [vmem:[#allocation5] sm:$0xff]   ;;  %v4915_v46 = vld [vmem:[%s5411_s2 + $0xb0] ss:$8 sps:$4 sm:$0xff]  }
  0x80   : > { %4577 = vmatprep.subr.bf16.mxu1 %v4844_v47  ;;  %v4901_v40 = vld [vmem:[%s5411_s2 + $0xa4] ss:$8 sps:$4 sm:$0xff]   ;;  %v4916_v47 = vld [vmem:[%s5411_s2 + $0x1b0] ss:$8 sps:$4 sm:$0xff]  }
  0x81   : > { %4466 = vmatpush3.bf16.msra.mxu0 %v4845_v49  ;;  %v4903_v41 = vld [vmem:[%s5411_s2 + $0x1a4] ss:$8 sps:$4 sm:$0xff]  }
  0x82   : > { %4578 = vmatpush3.bf16.msra.mxu1 %v4846_v50  ;;  %4467 = vmatprep.subr.bf16.mxu0 %v4859_v55  ;;  %v4919_v49 = vld [vmem:[%s5411_s2 + $0x1c4] ss:$8 sps:$4 sm:$0xff]   ;;  %v4921_v50 = vld [vmem:[%s5411_s2 + $0xc0] ss:$8 sps:$4 sm:$0xff]   ;;  %v4932_v55 = vld [vmem:[%s5411_s2 + $0x1d0] ss:$8 sps:$4 sm:$0xff]  }
  0x83   : > { %4579 = vmatprep.subr.bf16.mxu1 %v4860_v58  ;;  %v4937_v58 = vld [vmem:[%s5411_s2 + $0xe0] ss:$8 sps:$4 sm:$0xff]  }
  0x84   : > { %655 = vmatmul.mubr.bf16.gmra.mxu0 %v4835_v42  ;;  %v4905_v42 = vld [vmem:[%s5411_s2 + $0xa0] ss:$8 sps:$4 sm:$0xff]  }
  0x85   : > { %1404 = vmatmul.mubr.bf16.gmra.mxu1 %v4836_v43  ;;  %662 = vmatprep.mubr.bf16.mxu0 %v4837_v44  ;;  %v4906_v43 = vld [vmem:[%s5411_s2 + $0x1a0] ss:$8 sps:$4 sm:$0xff]   ;;  %v4911_v44 = vld [vmem:[%s5411_s2 + $0xb4] ss:$8 sps:$4 sm:$0xff]  }
  0x86   : > { %1411 = vmatprep.mubr.bf16.mxu1 %v4839_v45  ;;  %4468 = vmatpush3.bf16.msra.mxu0 %v4861_v59  ;;  %v4913_v45 = vld [vmem:[%s5411_s2 + $0x1b4] ss:$8 sps:$4 sm:$0xff]   ;;  %v4938_v59 = vld [vmem:[%s5411_s2 + $0x1e0] ss:$8 sps:$4 sm:$0xff]  }
  0x87   : > { %4580 = vmatpush3.bf16.msra.mxu1 %v4862_v60  ;;  %4469 = vmatprep.subr.bf16.mxu0 %v4875_v1  ;;  %v4943_v60 = vld [vmem:[%s5411_s2 + $0xf4] ss:$8 sps:$4 sm:$0xff]   ;;  %v4954_v1 = vld [vmem:[%s5411_s2 + $0x304] ss:$8 sps:$4 sm:$0xff]  }
  0x88   : > { %4581 = vmatprep.subr.bf16.mxu1 %v4876_v3  ;;  %v4952_v3 = vld [vmem:[%s5411_s2 + $0x300] ss:$8 sps:$4 sm:$0xff]  }
  0x8a   : > { %4470 = vmatpush3.bf16.msra.mxu0 %v4877_v4  ;;  %v4955_v4 = vld [vmem:[%s5411_s2 + $0x214] ss:$8 sps:$4 sm:$0xff]  }
  0x8b   : > { %4582 = vmatpush3.bf16.msra.mxu1 %v4878_v5  ;;  %4471 = vmatprep.subr.bf16.mxu0 %v4891_v10  ;;  %v4957_v5 = vld [vmem:[%s5411_s2 + $0x314] ss:$8 sps:$4 sm:$0xff]   ;;  %v4965_v10 = vld [vmem:[%s5411_s2 + $0x220] ss:$8 sps:$4 sm:$0xff]  }
  0x8c   : > { %663 = vmatmul.mubr.bf16.gmra.mxu0 %v4841_v48  ;;  %4583 = vmatprep.subr.bf16.mxu1 %v4892_v11  ;;  %v4917_v48 = vld [vmem:[%s5411_s2 + $0xc4] ss:$8 sps:$4 sm:$0xff]   ;;  %v4966_v11 = vld [vmem:[%s5411_s2 + $0x320] ss:$8 sps:$4 sm:$0xff]  }
  0x8d   : > { %1412 = vmatmul.mubr.bf16.gmra.mxu1 %v4842_v51  ;;  %670 = vmatprep.mubr.bf16.mxu0 %v4847_v52  ;;  %v4922_v51 = vld [vmem:[%s5411_s2 + $0x1c0] ss:$8 sps:$4 sm:$0xff]   ;;  %v4927_v52 = vld [vmem:[%s5411_s2 + $0xd4] ss:$8 sps:$4 sm:$0xff]  }
  0x8e   : > { %1419 = vmatprep.mubr.bf16.mxu1 %v4849_v53  ;;  %4472 = vmatpush3.bf16.msra.mxu0 %v4893_v12  ;;  %v4929_v53 = vld [vmem:[%s5411_s2 + $0x1d4] ss:$8 sps:$4 sm:$0xff]  }
  0x8f   : > { %4584 = vmatpush3.bf16.msra.mxu1 %v4894_v13  ;;  %4473 = vmatprep.subr.bf16.mxu0 %v4907_v18  ;;  %v4967_v12 = vld [vmem:[%s5411_s2 + $0x234] ss:$8 sps:$4 sm:$0xff]   ;;  %v4977_v18 = vld [vmem:[%s5411_s2 + $0x240] ss:$8 sps:$4 sm:$0xff]  }
  0x90   : > { %4585 = vmatprep.subr.bf16.mxu1 %v4908_v19  ;;  %v4969_v13 = vld [vmem:[%s5411_s2 + $0x334] ss:$8 sps:$4 sm:$0xff]   ;;  %v4978_v19 = vld [vmem:[%s5411_s2 + $0x340] ss:$8 sps:$4 sm:$0xff]  }
  0x92   : > { %4474 = vmatpush3.bf16.msra.mxu0 %v4909_v20  ;;  %v4979_v20 = vld [vmem:[%s5411_s2 + $0x254] ss:$8 sps:$4 sm:$0xff]  }
  0x93   : > { %4586 = vmatpush3.bf16.msra.mxu1 %v4910_v21  ;;  %4475 = vmatprep.subr.bf16.mxu0 %v4923_v26  ;;  %v4981_v21 = vld [vmem:[%s5411_s2 + $0x354] ss:$8 sps:$4 sm:$0xff]   ;;  %v4989_v26 = vld [vmem:[%s5411_s2 + $0x260] ss:$8 sps:$4 sm:$0xff]  }
  0x94   : > { %671 = vmatmul.mubr.bf16.gmra.mxu0 %v4851_v54  ;;  %4587 = vmatprep.subr.bf16.mxu1 %v4924_v27  ;;  %v4931_v54 = vld [vmem:[%s5411_s2 + $0xd0] ss:$8 sps:$4 sm:$0xff]   ;;  %v4990_v27 = vld [vmem:[%s5411_s2 + $0x360] ss:$8 sps:$4 sm:$0xff]  }
  0x95   : > { %1420 = vmatmul.mubr.bf16.gmra.mxu1 %v4852_v56  ;;  %678 = vmatprep.mubr.bf16.mxu0 %v4853_v57  ;;  %v4933_v56 = vld [vmem:[%s5411_s2 + $0xe4] ss:$8 sps:$4 sm:$0xff]  }
  0x96   : > { %1427 = vmatprep.mubr.bf16.mxu1 %v4855_v61  ;;  %4476 = vmatpush3.bf16.msra.mxu0 %v4925_v28  ;;  %v4935_v57 = vld [vmem:[%s5411_s2 + $0x1e4] ss:$8 sps:$4 sm:$0xff]   ;;  %v4945_v61 = vld [vmem:[%s5411_s2 + $0x1f4] ss:$8 sps:$4 sm:$0xff]  }
  0x97   : > { %4588 = vmatpush3.bf16.msra.mxu1 %v4926_v29  ;;  %4477 = vmatprep.subr.bf16.mxu0 %v4939_v34  ;;  %v4991_v28 = vld [vmem:[%s5411_s2 + $0x274] ss:$8 sps:$4 sm:$0xff]   ;;  %v5001_v34 = vld [vmem:[%s5411_s2 + $0x280] ss:$8 sps:$4 sm:$0xff]  }
  0x98   : > { %4589 = vmatprep.subr.bf16.mxu1 %v4940_v35  ;;  %v4993_v29 = vld [vmem:[%s5411_s2 + $0x374] ss:$8 sps:$4 sm:$0xff]   ;;  %v5002_v35 = vld [vmem:[%s5411_s2 + $0x380] ss:$8 sps:$4 sm:$0xff]  }
  0x9a   : > { %4478 = vmatpush3.bf16.msra.mxu0 %v4941_v37  ;;  %v5005_v37 = vld [vmem:[%s5411_s2 + $0x394] ss:$8 sps:$4 sm:$0xff]  }
  0x9b   : > { %4590 = vmatpush3.bf16.msra.mxu1 %v4942_v38 }
  0x9c   : > { %679 = vmatmul.mubr.bf16.gmra.mxu0 %v4857_v62  ;;  %v4947_v62 = vld [vmem:[%s5411_s2 + $0xf0] ss:$8 sps:$4 sm:$0xff]  }
  0x9d   : > { %1428 = vmatmul.mubr.bf16.gmra.mxu1 %v4858_v63  ;;  %686 = vmatprep.mubr.bf16.mxu0 %v4863_v0  ;;  %v4948_v63 = vld [vmem:[%s5411_s2 + $0x1f0] ss:$8 sps:$4 sm:$0xff]   ;;  %v4951_v0 = vld [vmem:[%s5411_s2 + $0x204] ss:$8 sps:$4 sm:$0xff]  }
  0x9e   : > { %1435 = vmatprep.mubr.bf16.mxu1 %v4865_v2  ;;  %v4949_v2 = vld [vmem:[%s5411_s2 + $0x200] ss:$8 sps:$4 sm:$0xff]  }
  0xa4   : > { %687 = vmatmul.mubr.bf16.gmra.mxu0 %v4867_v6  ;;  %v4959_v6 = vld [vmem:[%s5411_s2 + $0x210] ss:$8 sps:$4 sm:$0xff]  }
  0xa5   : > { %1436 = vmatmul.mubr.bf16.gmra.mxu1 %v4868_v7  ;;  %694 = vmatprep.mubr.bf16.mxu0 %v4869_v8  ;;  %v4960_v7 = vld [vmem:[%s5411_s2 + $0x310] ss:$8 sps:$4 sm:$0xff]   ;;  %v4961_v8 = vld [vmem:[%s5411_s2 + $0x224] ss:$8 sps:$4 sm:$0xff]  }
  0xa6   : > { %1443 = vmatprep.mubr.bf16.mxu1 %v4871_v9  ;;  %v4963_v9 = vld [vmem:[%s5411_s2 + $0x324] ss:$8 sps:$4 sm:$0xff]  }
  0xac   : > { %695 = vmatmul.mubr.bf16.gmra.mxu0 %v4873_v14  ;;  %v4971_v14 = vld [vmem:[%s5411_s2 + $0x230] ss:$8 sps:$4 sm:$0xff]  }
  0xad   : > { %1444 = vmatmul.mubr.bf16.gmra.mxu1 %v4874_v15  ;;  %702 = vmatprep.mubr.bf16.mxu0 %v4879_v16  ;;  %v4972_v15 = vld [vmem:[%s5411_s2 + $0x330] ss:$8 sps:$4 sm:$0xff]   ;;  %v4973_v16 = vld [vmem:[%s5411_s2 + $0x244] ss:$8 sps:$4 sm:$0xff]  }
  0xae   : > { %1451 = vmatprep.mubr.bf16.mxu1 %v4881_v17  ;;  %v4975_v17 = vld [vmem:[%s5411_s2 + $0x344] ss:$8 sps:$4 sm:$0xff]  }
  0xb4   : > { %703 = vmatmul.mubr.bf16.gmra.mxu0 %v4883_v22  ;;  %v4983_v22 = vld [vmem:[%s5411_s2 + $0x250] ss:$8 sps:$4 sm:$0xff]  }
  0xb5   : > { %1452 = vmatmul.mubr.bf16.gmra.mxu1 %v4884_v23  ;;  %710 = vmatprep.mubr.bf16.mxu0 %v4885_v24  ;;  %v4984_v23 = vld [vmem:[%s5411_s2 + $0x350] ss:$8 sps:$4 sm:$0xff]   ;;  %v4985_v24 = vld [vmem:[%s5411_s2 + $0x264] ss:$8 sps:$4 sm:$0xff]  }
  0xb6   : > { %1459 = vmatprep.mubr.bf16.mxu1 %v4887_v25  ;;  %v4987_v25 = vld [vmem:[%s5411_s2 + $0x364] ss:$8 sps:$4 sm:$0xff]  }
  0xbc   : > { %711 = vmatmul.mubr.bf16.gmra.mxu0 %v4889_v30  ;;  %v4995_v30 = vld [vmem:[%s5411_s2 + $0x270] ss:$8 sps:$4 sm:$0xff]  }
  0xbd   : > { %1460 = vmatmul.mubr.bf16.gmra.mxu1 %v4890_v31  ;;  %718 = vmatprep.mubr.bf16.mxu0 %v4895_v32  ;;  %v4996_v31 = vld [vmem:[%s5411_s2 + $0x370] ss:$8 sps:$4 sm:$0xff]   ;;  %v4997_v32 = vld [vmem:[%s5411_s2 + $0x284] ss:$8 sps:$4 sm:$0xff]  }
  0xbe   : > { %1467 = vmatprep.mubr.bf16.mxu1 %v4897_v33  ;;  %v4999_v33 = vld [vmem:[%s5411_s2 + $0x384] ss:$8 sps:$4 sm:$0xff]  }
  0xc4   : > { %719 = vmatmul.mubr.bf16.gmra.mxu0 %v4899_v36  ;;  %v5003_v36 = vld [vmem:[%s5411_s2 + $0x294] ss:$8 sps:$4 sm:$0xff]  }
  0xc5   : > { %1468 = vmatmul.mubr.bf16.gmra.mxu1 %v4900_v39  ;;  %726 = vmatprep.mubr.bf16.mxu0 %v4901_v40  ;;  %v5527_v40 = vld [vmem:[#allocation7] ss:$0 sm:$0xff] }
  0xc6   : > { %1475 = vmatprep.mubr.bf16.mxu1 %v4903_v41 }
  0xcc   : > { %727 = vmatmul.mubr.bf16.gmra.mxu0 %v4905_v42 }
  0xcd   : > { %1476 = vmatmul.mubr.bf16.gmra.mxu1 %v4906_v43  ;;  %734 = vmatprep.mubr.bf16.mxu0 %v4911_v44 }
  0xce   : > { %1483 = vmatprep.mubr.bf16.mxu1 %v4913_v45 }
  0xd4   : > { %735 = vmatmul.mubr.bf16.gmra.mxu0 %v4915_v46  ;;  %v5007_v46 = vld [vmem:[%s5411_s2 + $0x290] ss:$8 sps:$4 sm:$0xff]  }
  0xd5   : > { %1484 = vmatmul.mubr.bf16.gmra.mxu1 %v4916_v47  ;;  %742 = vmatprep.mubr.bf16.mxu0 %v4917_v48 }
  0xd6   : > { %1491 = vmatprep.mubr.bf16.mxu1 %v4919_v49  ;;  %v5008_v49 = vld [vmem:[%s5411_s2 + $0x390] ss:$8 sps:$4 sm:$0xff]  }
  0xdc   : > { %743 = vmatmul.mubr.bf16.gmra.mxu0 %v4921_v50  ;;  %v5009_v50 = vld [vmem:[%s5411_s2 + $0x2a4] ss:$8 sps:$4 sm:$0xff]  }
  0xdd   : > { %1492 = vmatmul.mubr.bf16.gmra.mxu1 %v4922_v51  ;;  %750 = vmatprep.mubr.bf16.mxu0 %v4927_v52  ;;  %v5533_v51 = vld [vmem:[#allocation8] ss:$0 sm:$0xff] }
  0xde   : > { %1499 = vmatprep.mubr.bf16.mxu1 %v4929_v53 }
  0xe4   : > { %751 = vmatmul.mubr.bf16.gmra.mxu0 %v4931_v54  ;;  %v5011_v54 = vld [vmem:[%s5411_s2 + $0x3a4] ss:$8 sps:$4 sm:$0xff]  }
  0xe5   : > { %1500 = vmatmul.mubr.bf16.gmra.mxu1 %v4932_v55  ;;  %758 = vmatprep.mubr.bf16.mxu0 %v4933_v56 }
  0xe6   : > { %1507 = vmatprep.mubr.bf16.mxu1 %v4935_v57 }
  0xec   : > { %759 = vmatmul.mubr.bf16.gmra.mxu0 %v4937_v58 }
  0xed   : > { %1508 = vmatmul.mubr.bf16.gmra.mxu1 %v4938_v59  ;;  %766 = vmatprep.mubr.bf16.mxu0 %v4943_v60 }
  0xee   : > { %1515 = vmatprep.mubr.bf16.mxu1 %v4945_v61 }
  0xf4   : > { %767 = vmatmul.mubr.bf16.gmra.mxu0 %v4947_v62 }
  0xf5   : > { %1516 = vmatmul.mubr.bf16.gmra.mxu1 %v4948_v63  ;;  %2132 = vmatprep.mubr.bf16.mxu0 %v4951_v0 }
  0xf6   : > { %2869 = vmatprep.mubr.bf16.mxu1 %v4954_v1 }
  0xfc   : > { %2133 = vmatmul.mubr.bf16.vlgmr.msra.gmra.mxu0 %v4949_v2 }
  0xfd   : > { %2870 = vmatmul.mubr.bf16.vlgmr.msra.gmra.mxu1 %v4952_v3  ;;  %2140 = vmatprep.mubr.bf16.mxu0 %v4955_v4 }
  0xfe   : > { %2877 = vmatprep.mubr.bf16.mxu1 %v4957_v5 }
 0x104   : > { %2141 = vmatmul.mubr.bf16.gmra.mxu0 %v4959_v6 }
 0x105   : > { %2878 = vmatmul.mubr.bf16.gmra.mxu1 %v4960_v7  ;;  %2148 = vmatprep.mubr.bf16.mxu0 %v4961_v8  ;;  %v5013_v7 = vld [vmem:[%s5411_s2 + $0x2a0] ss:$8 sps:$4 sm:$0xff]  }
 0x106   : > { %2885 = vmatprep.mubr.bf16.mxu1 %v4963_v9 }
 0x10c   : > { %2149 = vmatmul.mubr.bf16.gmra.mxu0 %v4965_v10 }
 0x10d   : > { %2886 = vmatmul.mubr.bf16.gmra.mxu1 %v4966_v11  ;;  %2156 = vmatprep.mubr.bf16.mxu0 %v4967_v12  ;;  %v5014_v12 = vld [vmem:[%s5411_s2 + $0x3a0] ss:$8 sps:$4 sm:$0xff]  }
 0x10e   : > { %2893 = vmatprep.mubr.bf16.mxu1 %v4969_v13  ;;  %v5015_v13 = vld [vmem:[%s5411_s2 + $0x2b4] ss:$8 sps:$4 sm:$0xff]  }
 0x114   : > { %2157 = vmatmul.mubr.bf16.gmra.mxu0 %v4971_v14 }
 0x115   : > { %2894 = vmatmul.mubr.bf16.gmra.mxu1 %v4972_v15  ;;  %2164 = vmatprep.mubr.bf16.mxu0 %v4973_v16 }
 0x116   : > { %2901 = vmatprep.mubr.bf16.mxu1 %v4975_v17 }
 0x11c   : > { %2165 = vmatmul.mubr.bf16.gmra.mxu0 %v4977_v18  ;;  %v5017_v18 = vld [vmem:[%s5411_s2 + $0x3b4] ss:$8 sps:$4 sm:$0xff]  }
 0x11d   : > { %2902 = vmatmul.mubr.bf16.gmra.mxu1 %v4978_v19  ;;  %2172 = vmatprep.mubr.bf16.mxu0 %v4979_v20 }
 0x11e   : > { %2909 = vmatprep.mubr.bf16.mxu1 %v4981_v21 }
 0x124   : > { %2173 = vmatmul.mubr.bf16.gmra.mxu0 %v4983_v22 }
 0x125   : > { %2910 = vmatmul.mubr.bf16.gmra.mxu1 %v4984_v23  ;;  %2180 = vmatprep.mubr.bf16.mxu0 %v4985_v24 }
 0x126   : > { %2917 = vmatprep.mubr.bf16.mxu1 %v4987_v25 }
 0x12c   : > { %2181 = vmatmul.mubr.bf16.gmra.mxu0 %v4989_v26 }
 0x12d   : > { %2918 = vmatmul.mubr.bf16.gmra.mxu1 %v4990_v27  ;;  %2188 = vmatprep.mubr.bf16.mxu0 %v4991_v28 }
 0x12e   : > { %2925 = vmatprep.mubr.bf16.mxu1 %v4993_v29 }
 0x134   : > { %2189 = vmatmul.mubr.bf16.gmra.mxu0 %v4995_v30 }
 0x135   : > { %2926 = vmatmul.mubr.bf16.gmra.mxu1 %v4996_v31  ;;  %2196 = vmatprep.mubr.bf16.mxu0 %v4997_v32 }
 0x136   : > { %2933 = vmatprep.mubr.bf16.mxu1 %v4999_v33 }
 0x13c   : > { %v4255_v38 = vpop.f32.mrf.mxu0  ;;  %2197 = vmatmul.mubr.bf16.gmra.mxu0 %v5001_v34 }
 0x13d   : > { %v4367_v39 = vpop.f32.mrf.mxu1  ;;  %2934 = vmatmul.mubr.bf16.gmra.mxu1 %v5002_v35  ;;  %2204 = vmatprep.mubr.bf16.mxu0 %v5003_v36 }
 0x13e   : > { %v4256_v41 = vpop.f32.mrf.mxu0  ;;  %2941 = vmatprep.mubr.bf16.mxu1 %v5005_v37  ;;  %v5019_v37 = vld [vmem:[%s5411_s2 + $0x2b0] ss:$8 sps:$4 sm:$0xff]  }
 0x13f   : > { %v4257_v42 = vadd.f32 %v4256_v41, %v4255_v38  ;;  %v4368_v43 = vpop.f32.mrf.mxu1 }
 0x140   : > { %v4369_v44 = vadd.f32 %v4368_v43, %v4367_v39  ;;  %v4258_v45 = vpop.f32.mrf.mxu0  ;;  %v5020_v43 = vld [vmem:[%s5411_s2 + $0x3b0] ss:$8 sps:$4 sm:$0xff]  }
 0x141   : > { %v781_v47 = vmul.f32 %v4257_v42, %v5527_v40  ;;  %v4370_v48 = vpop.f32.mrf.mxu1 }
 0x142   : > { %v1524_v52 = vmul.f32 %v4369_v44, %v5527_v40  ;;  %v4259_v53 = vpop.f32.mrf.mxu0  ;;  %v5023_v44 = vld [vmem:[%s5411_s2 + $0x2c4] ss:$8 sps:$4 sm:$0xff]  }
 0x143   : > { %v4260_v55 = vadd.f32 %v4259_v53, %v4258_v45  ;;  %v4371_v56 = vpop.f32.mrf.mxu1  ;;  %v819_v59 = vadd.f32 %v5533_v51, %v781_v47 }
 0x144   : > { %v4372_v57 = vadd.f32 %v4371_v56, %v4370_v48  ;;  %v4261_v58 = vpop.f32.mrf.mxu0  ;;  %2205 = vmatmul.mubr.bf16.gmra.mxu0 %v5007_v46  ;;  %v1556_v62 = vadd.f32 %v5533_v51, %v1524_v52 }
 0x145   : > { %v782_v60 = vmul.f32 %v4260_v55, %v5527_v40  ;;  %v4373_v61 = vpop.f32.mrf.mxu1  ;;  %2942 = vmatmul.mubr.bf16.gmra.mxu1 %v5008_v49  ;;  %2212 = vmatprep.mubr.bf16.mxu0 %v5009_v50  ;;  %v851_v8 = vmax.f32 %v819_v59, 0.0  ;;  %v5026_v49 = vld [vmem:[%s5411_s2 + $0x3c4] ss:$8 sps:$4 sm:$0xff]  }
 0x146   : > { %v1525_v63 = vmul.f32 %v4372_v57, %v5527_v40  ;;  %v4262_v0 = vpop.f32.mrf.mxu0  ;;  %2949 = vmatprep.mubr.bf16.mxu1 %v5011_v54  ;;  %v1588_v14 = vmax.f32 %v1556_v62, 0.0 }
 0x147   : > { %v820_v1 = vadd.f32 %v5533_v51, %v782_v60  ;;  %v4263_v2 = vadd.f32 %v4262_v0, %v4261_v58  ;;  %v4374_v3 = vpop.f32.mrf.mxu1 }
 0x148   : > { %v1557_v4 = vadd.f32 %v5533_v51, %v1525_v63  ;;  %v4375_v5 = vadd.f32 %v4374_v3, %v4373_v61  ;;  %v4264_v6 = vpop.f32.mrf.mxu0 }
 0x149   : > { %v852_v9 = vmax.f32 %v820_v1, 0.0  ;;  %v783_v10 = vmul.f32 %v4263_v2, %v5527_v40  ;;  %v4376_v11 = vpop.f32.mrf.mxu1 }
 0x14a   : > { %v1589_v15 = vmax.f32 %v1557_v4, 0.0  ;;  %v1526_v16 = vmul.f32 %v4375_v5, %v5527_v40  ;;  %v4265_v17 = vpop.f32.mrf.mxu0  ;;  %v5021_v5 = vld [vmem:[%s5411_s2 + $0x2c0] ss:$8 sps:$4 sm:$0xff]  }
 0x14b   : > { %v3859_v19 = vpack.c.bf16 %v852_v9, %v851_v8  ;;  %v4266_v20 = vadd.f32 %v4265_v17, %v4264_v6  ;;  %v4377_v21 = vpop.f32.mrf.mxu1  ;;  %v821_v25 = vadd.f32 %v5533_v51, %v783_v10  ;;  %v5024_v10 = vld [vmem:[%s5411_s2 + $0x3c0] ss:$8 sps:$4 sm:$0xff]  }
 0x14c   : > { %v3939_v22 = vpack.c.bf16 %v1589_v15, %v1588_v14  ;;  %v4378_v23 = vadd.f32 %v4377_v21, %v4376_v11  ;;  %v4267_v24 = vpop.f32.mrf.mxu0  ;;  %2213 = vmatmul.mubr.bf16.gmra.mxu0 %v5013_v7  ;;  %v1558_v28 = vadd.f32 %v5533_v51, %v1526_v16  ;;  %v5029_v11 = vld [vmem:[%s5411_s2 + $0x2d4] ss:$8 sps:$4 sm:$0xff]  }
 0x14d   : > { %3860 = vst [vmem:[%s5550_s25] sm:$0xff] %v3859_v19   ;;  %v784_v26 = vmul.f32 %v4266_v20, %v5527_v40  ;;  %v4379_v27 = vpop.f32.mrf.mxu1  ;;  %2950 = vmatmul.mubr.bf16.gmra.mxu1 %v5014_v12  ;;  %2220 = vmatprep.mubr.bf16.mxu0 %v5015_v13  ;;  %v853_v38 = vmax.f32 %v821_v25, 0.0  ;;  %v5032_v16 = vld [vmem:[%s5411_s2 + $0x3d4] ss:$8 sps:$4 sm:$0xff]  }
 0x14e   : > { %4191 = vst [vmem:[%s5550_s25 + $0x80] sm:$0xff] %v3939_v22   ;;  %v1527_v29 = vmul.f32 %v4378_v23, %v5527_v40  ;;  %v4268_v30 = vpop.f32.mrf.mxu0  ;;  %2957 = vmatprep.mubr.bf16.mxu1 %v5017_v18  ;;  %v1590_v45 = vmax.f32 %v1558_v28, 0.0 }
 0x14f   : > { %v822_v31 = vadd.f32 %v5533_v51, %v784_v26  ;;  %v4269_v32 = vadd.f32 %v4268_v30, %v4267_v24  ;;  %v4380_v33 = vpop.f32.mrf.mxu1 }
 0x150   : > { %v1559_v34 = vadd.f32 %v5533_v51, %v1527_v29  ;;  %v4381_v35 = vadd.f32 %v4380_v33, %v4379_v27  ;;  %v4270_v36 = vpop.f32.mrf.mxu0 }
 0x151   : > { %v854_v39 = vmax.f32 %v822_v31, 0.0  ;;  %v785_v41 = vmul.f32 %v4269_v32, %v5527_v40  ;;  %v4382_v42 = vpop.f32.mrf.mxu1 }
 0x152   : > { %v1591_v46 = vmax.f32 %v1559_v34, 0.0  ;;  %v1528_v47 = vmul.f32 %v4381_v35, %v5527_v40  ;;  %v4271_v48 = vpop.f32.mrf.mxu0  ;;  %v5027_v35 = vld [vmem:[%s5411_s2 + $0x2d0] ss:$8 sps:$4 sm:$0xff]  }
 0x153   : > { %v3864_v50 = vpack.c.bf16 %v854_v39, %v853_v38  ;;  %v4272_v52 = vadd.f32 %v4271_v48, %v4270_v36  ;;  %v4383_v53 = vpop.f32.mrf.mxu1  ;;  %v823_v57 = vadd.f32 %v5533_v51, %v785_v41  ;;  %v5030_v41 = vld [vmem:[%s5411_s2 + $0x3d0] ss:$8 sps:$4 sm:$0xff]  }
 0x154   : > { %v3944_v54 = vpack.c.bf16 %v1591_v46, %v1590_v45  ;;  %v4384_v55 = vadd.f32 %v4383_v53, %v4382_v42  ;;  %v4273_v56 = vpop.f32.mrf.mxu0  ;;  %2221 = vmatmul.mubr.bf16.gmra.mxu0 %v5019_v37  ;;  %v1560_v60 = vadd.f32 %v5533_v51, %v1528_v47  ;;  %v5035_v42 = vld [vmem:[%s5411_s2 + $0x2e4] ss:$8 sps:$4 sm:$0xff]  }
 0x155   : > { %4176 = vst [vmem:[%s5550_s25 + $0x8] sm:$0xff] %v3864_v50   ;;  %v786_v58 = vmul.f32 %v4272_v52, %v5527_v40  ;;  %v4385_v59 = vpop.f32.mrf.mxu1  ;;  %2958 = vmatmul.mubr.bf16.gmra.mxu1 %v5020_v43  ;;  %2228 = vmatprep.mubr.bf16.mxu0 %v5023_v44  ;;  %v855_v6 = vmax.f32 %v823_v57, 0.0  ;;  %v5038_v47 = vld [vmem:[%s5411_s2 + $0x3e4] ss:$8 sps:$4 sm:$0xff]  }
 0x156   : > { %4192 = vst [vmem:[%s5550_s25 + $0x88] sm:$0xff] %v3944_v54   ;;  %v1529_v61 = vmul.f32 %v4384_v55, %v5527_v40  ;;  %v4274_v62 = vpop.f32.mrf.mxu0  ;;  %2965 = vmatprep.mubr.bf16.mxu1 %v5026_v49  ;;  %v1592_v12 = vmax.f32 %v1560_v60, 0.0 }
 0x157   : > { %v824_v63 = vadd.f32 %v5533_v51, %v786_v58  ;;  %v4275_v0 = vadd.f32 %v4274_v62, %v4273_v56  ;;  %v4386_v1 = vpop.f32.mrf.mxu1 }
 0x158   : > { %v1561_v2 = vadd.f32 %v5533_v51, %v1529_v61  ;;  %v4387_v3 = vadd.f32 %v4386_v1, %v4385_v59  ;;  %v4276_v4 = vpop.f32.mrf.mxu0 }
 0x159   : > { %v856_v7 = vmax.f32 %v824_v63, 0.0  ;;  %v787_v8 = vmul.f32 %v4275_v0, %v5527_v40  ;;  %v4388_v9 = vpop.f32.mrf.mxu1 }
 0x15a   : > { %v1593_v13 = vmax.f32 %v1561_v2, 0.0  ;;  %v1530_v14 = vmul.f32 %v4387_v3, %v5527_v40  ;;  %v4277_v15 = vpop.f32.mrf.mxu0  ;;  %v5033_v3 = vld [vmem:[%s5411_s2 + $0x2e0] ss:$8 sps:$4 sm:$0xff]  }
 0x15b   : > { %v3869_v17 = vpack.c.bf16 %v856_v7, %v855_v6  ;;  %v4278_v18 = vadd.f32 %v4277_v15, %v4276_v4  ;;  %v4389_v19 = vpop.f32.mrf.mxu1  ;;  %v825_v23 = vadd.f32 %v5533_v51, %v787_v8  ;;  %v5036_v8 = vld [vmem:[%s5411_s2 + $0x3e0] ss:$8 sps:$4 sm:$0xff]  }
 0x15c   : > { %v3949_v20 = vpack.c.bf16 %v1593_v13, %v1592_v12  ;;  %v4390_v21 = vadd.f32 %v4389_v19, %v4388_v9  ;;  %v4279_v22 = vpop.f32.mrf.mxu0  ;;  %2229 = vmatmul.mubr.bf16.gmra.mxu0 %v5021_v5  ;;  %v1562_v26 = vadd.f32 %v5533_v51, %v1530_v14  ;;  %v5041_v9 = vld [vmem:[%s5411_s2 + $0x2f4] ss:$8 sps:$4 sm:$0xff]  }
 0x15d   : > { %4177 = vst [vmem:[%s5550_s25 + $0x10] sm:$0xff] %v3869_v17   ;;  %v788_v24 = vmul.f32 %v4278_v18, %v5527_v40  ;;  %v4391_v25 = vpop.f32.mrf.mxu1  ;;  %2966 = vmatmul.mubr.bf16.gmra.mxu1 %v5024_v10  ;;  %2236 = vmatprep.mubr.bf16.mxu0 %v5029_v11  ;;  %v857_v36 = vmax.f32 %v825_v23, 0.0  ;;  %v5044_v14 = vld [vmem:[%s5411_s2 + $0x3f4] ss:$8 sps:$4 sm:$0xff]  }
 0x15e   : > { %4193 = vst [vmem:[%s5550_s25 + $0x90] sm:$0xff] %v3949_v20   ;;  %v1531_v27 = vmul.f32 %v4390_v21, %v5527_v40  ;;  %v4280_v28 = vpop.f32.mrf.mxu0  ;;  %2973 = vmatprep.mubr.bf16.mxu1 %v5032_v16  ;;  %v1594_v43 = vmax.f32 %v1562_v26, 0.0 }
 0x15f   : > { %v826_v29 = vadd.f32 %v5533_v51, %v788_v24  ;;  %v4281_v30 = vadd.f32 %v4280_v28, %v4279_v22  ;;  %v4392_v31 = vpop.f32.mrf.mxu1 }
 0x160   : > { %v1563_v32 = vadd.f32 %v5533_v51, %v1531_v27  ;;  %v4393_v33 = vadd.f32 %v4392_v31, %v4391_v25  ;;  %v4282_v34 = vpop.f32.mrf.mxu0 }
 0x161   : > { %v858_v37 = vmax.f32 %v826_v29, 0.0  ;;  %v789_v38 = vmul.f32 %v4281_v30, %v5527_v40  ;;  %v4394_v39 = vpop.f32.mrf.mxu1 }
 0x162   : > { %v1595_v44 = vmax.f32 %v1563_v32, 0.0  ;;  %v1532_v45 = vmul.f32 %v4393_v33, %v5527_v40  ;;  %v4283_v46 = vpop.f32.mrf.mxu0  ;;  %v5039_v33 = vld [vmem:[%s5411_s2 + $0x2f0] ss:$8 sps:$4 sm:$0xff]  }
 0x163   : > { %v3874_v48 = vpack.c.bf16 %v858_v37, %v857_v36  ;;  %v4284_v49 = vadd.f32 %v4283_v46, %v4282_v34  ;;  %v4395_v50 = vpop.f32.mrf.mxu1  ;;  %v827_v55 = vadd.f32 %v5533_v51, %v789_v38  ;;  %v5042_v38 = vld [vmem:[%s5411_s2 + $0x3f0] ss:$8 sps:$4 sm:$0xff]  }
 0x164   : > { %v3954_v52 = vpack.c.bf16 %v1595_v44, %v1594_v43  ;;  %v4396_v53 = vadd.f32 %v4395_v50, %v4394_v39  ;;  %v4285_v54 = vpop.f32.mrf.mxu0  ;;  %2237 = vmatmul.mubr.bf16.gmra.mxu0 %v5027_v35  ;;  %v1564_v58 = vadd.f32 %v5533_v51, %v1532_v45 }
 0x165   : > { %4178 = vst [vmem:[%s5550_s25 + $0x18] sm:$0xff] %v3874_v48   ;;  %v790_v56 = vmul.f32 %v4284_v49, %v5527_v40  ;;  %v4397_v57 = vpop.f32.mrf.mxu1  ;;  %2974 = vmatmul.mubr.bf16.gmra.mxu1 %v5030_v41  ;;  %2244 = vmatprep.mubr.bf16.mxu0 %v5035_v42  ;;  %v859_v4 = vmax.f32 %v827_v55, 0.0 }
 0x166   : > { %4194 = vst [vmem:[%s5550_s25 + $0x98] sm:$0xff] %v3954_v52   ;;  %v1533_v59 = vmul.f32 %v4396_v53, %v5527_v40  ;;  %v4286_v60 = vpop.f32.mrf.mxu0  ;;  %2981 = vmatprep.mubr.bf16.mxu1 %v5038_v47  ;;  %v1596_v10 = vmax.f32 %v1564_v58, 0.0 }
 0x167   : > { %v828_v61 = vadd.f32 %v5533_v51, %v790_v56  ;;  %v4287_v62 = vadd.f32 %v4286_v60, %v4285_v54  ;;  %v4398_v63 = vpop.f32.mrf.mxu1 }
 0x168   : > { %v1565_v0 = vadd.f32 %v5533_v51, %v1533_v59  ;;  %v4399_v1 = vadd.f32 %v4398_v63, %v4397_v57  ;;  %v4288_v2 = vpop.f32.mrf.mxu0 }
 0x169   : > { %v860_v5 = vmax.f32 %v828_v61, 0.0  ;;  %v791_v6 = vmul.f32 %v4287_v62, %v5527_v40  ;;  %v4400_v7 = vpop.f32.mrf.mxu1 }
 0x16a   : > { %v1597_v11 = vmax.f32 %v1565_v0, 0.0  ;;  %v1534_v12 = vmul.f32 %v4399_v1, %v5527_v40  ;;  %v4289_v13 = vpop.f32.mrf.mxu0 }
 0x16b   : > { %v3879_v15 = vpack.c.bf16 %v860_v5, %v859_v4  ;;  %v4290_v16 = vadd.f32 %v4289_v13, %v4288_v2  ;;  %v4401_v17 = vpop.f32.mrf.mxu1  ;;  %v829_v21 = vadd.f32 %v5533_v51, %v791_v6 }
 0x16c   : > { %v3959_v18 = vpack.c.bf16 %v1597_v11, %v1596_v10  ;;  %v4402_v19 = vadd.f32 %v4401_v17, %v4400_v7  ;;  %v4291_v20 = vpop.f32.mrf.mxu0  ;;  %2245 = vmatmul.mubr.bf16.gmra.mxu0 %v5033_v3  ;;  %v1566_v24 = vadd.f32 %v5533_v51, %v1534_v12 }
 0x16d   : > { %4179 = vst [vmem:[%s5550_s25 + $0x20] sm:$0xff] %v3879_v15   ;;  %v792_v22 = vmul.f32 %v4290_v16, %v5527_v40  ;;  %v4403_v23 = vpop.f32.mrf.mxu1  ;;  %2982 = vmatmul.mubr.bf16.gmra.mxu1 %v5036_v8  ;;  %2252 = vmatprep.mubr.bf16.mxu0 %v5041_v9  ;;  %v861_v34 = vmax.f32 %v829_v21, 0.0 }
 0x16e   : > { %4195 = vst [vmem:[%s5550_s25 + $0xa0] sm:$0xff] %v3959_v18   ;;  %v1535_v25 = vmul.f32 %v4402_v19, %v5527_v40  ;;  %v4292_v26 = vpop.f32.mrf.mxu0  ;;  %2989 = vmatprep.mubr.bf16.mxu1 %v5044_v14  ;;  %v1598_v39 = vmax.f32 %v1566_v24, 0.0 }
 0x16f   : > { %v830_v27 = vadd.f32 %v5533_v51, %v792_v22  ;;  %v4293_v28 = vadd.f32 %v4292_v26, %v4291_v20  ;;  %v4404_v29 = vpop.f32.mrf.mxu1 }
 0x170   : > { %v1567_v30 = vadd.f32 %v5533_v51, %v1535_v25  ;;  %v4405_v31 = vadd.f32 %v4404_v29, %v4403_v23  ;;  %v4294_v32 = vpop.f32.mrf.mxu0 }
 0x171   : > { %v862_v35 = vmax.f32 %v830_v27, 0.0  ;;  %v793_v36 = vmul.f32 %v4293_v28, %v5527_v40  ;;  %v4406_v37 = vpop.f32.mrf.mxu1 }
 0x172   : > { %v1599_v41 = vmax.f32 %v1567_v30, 0.0  ;;  %v1536_v42 = vmul.f32 %v4405_v31, %v5527_v40  ;;  %v4295_v43 = vpop.f32.mrf.mxu0 }
 0x173   : > { %v3884_v44 = vpack.c.bf16 %v862_v35, %v861_v34  ;;  %v4296_v45 = vadd.f32 %v4295_v43, %v4294_v32  ;;  %v4407_v46 = vpop.f32.mrf.mxu1  ;;  %v831_v50 = vadd.f32 %v5533_v51, %v793_v36 }
 0x174   : > { %v3964_v47 = vpack.c.bf16 %v1599_v41, %v1598_v39  ;;  %v4408_v48 = vadd.f32 %v4407_v46, %v4406_v37  ;;  %v4297_v49 = vpop.f32.mrf.mxu0  ;;  %2253 = vmatmul.mubr.bf16.gmra.mxu0 %v5039_v33  ;;  %v1568_v54 = vadd.f32 %v5533_v51, %v1536_v42 }
 0x175   : > { %4180 = vst [vmem:[%s5550_s25 + $0x28] sm:$0xff] %v3884_v44   ;;  %v794_v52 = vmul.f32 %v4296_v45, %v5527_v40  ;;  %v4409_v53 = vpop.f32.mrf.mxu1  ;;  %2990 = vmatmul.mubr.bf16.gmra.mxu1 %v5042_v38  ;;  %v863_v63 = vmax.f32 %v831_v50, 0.0 }
 0x176   : > { %4196 = vst [vmem:[%s5550_s25 + $0xa8] sm:$0xff] %v3964_v47   ;;  %v1537_v55 = vmul.f32 %v4408_v48, %v5527_v40  ;;  %v4298_v56 = vpop.f32.mrf.mxu0  ;;  %v1600_v3 = vmax.f32 %v1568_v54, 0.0 }
 0x177   : > { %v832_v57 = vadd.f32 %v5533_v51, %v794_v52  ;;  %v4299_v58 = vadd.f32 %v4298_v56, %v4297_v49  ;;  %v4410_v59 = vpop.f32.mrf.mxu1 }
 0x178   : > { %v1569_v60 = vadd.f32 %v5533_v51, %v1537_v55  ;;  %v4411_v61 = vadd.f32 %v4410_v59, %v4409_v53  ;;  %v4300_v62 = vpop.f32.mrf.mxu0 }
 0x179   : > { %v864_v0 = vmax.f32 %v832_v57, 0.0  ;;  %v795_v1 = vmul.f32 %v4299_v58, %v5527_v40  ;;  %v4412_v2 = vpop.f32.mrf.mxu1 }
 0x17a   : > { %v1601_v4 = vmax.f32 %v1569_v60, 0.0  ;;  %v1538_v5 = vmul.f32 %v4411_v61, %v5527_v40  ;;  %v4301_v6 = vpop.f32.mrf.mxu0 }
 0x17b   : > { %v3889_v7 = vpack.c.bf16 %v864_v0, %v863_v63  ;;  %v4302_v8 = vadd.f32 %v4301_v6, %v4300_v62  ;;  %v4413_v9 = vpop.f32.mrf.mxu1  ;;  %v833_v13 = vadd.f32 %v5533_v51, %v795_v1 }
 0x17c   : > { %v3969_v10 = vpack.c.bf16 %v1601_v4, %v1600_v3  ;;  %v4414_v11 = vadd.f32 %v4413_v9, %v4412_v2  ;;  %v4303_v12 = vpop.f32.mrf.mxu0  ;;  %v1570_v16 = vadd.f32 %v5533_v51, %v1538_v5 }
 0x17d   : > { %4181 = vst [vmem:[%s5550_s25 + $0x30] sm:$0xff] %v3889_v7   ;;  %v796_v14 = vmul.f32 %v4302_v8, %v5527_v40  ;;  %v4415_v15 = vpop.f32.mrf.mxu1  ;;  %v865_v25 = vmax.f32 %v833_v13, 0.0 }
 0x17e   : > { %4197 = vst [vmem:[%s5550_s25 + $0xb0] sm:$0xff] %v3969_v10   ;;  %v1539_v17 = vmul.f32 %v4414_v11, %v5527_v40  ;;  %v4304_v18 = vpop.f32.mrf.mxu0  ;;  %v1602_v29 = vmax.f32 %v1570_v16, 0.0 }
 0x17f   : > { %v834_v19 = vadd.f32 %v5533_v51, %v796_v14  ;;  %v4305_v20 = vadd.f32 %v4304_v18, %v4303_v12  ;;  %v4416_v21 = vpop.f32.mrf.mxu1 }
 0x180   : > { %v1571_v22 = vadd.f32 %v5533_v51, %v1539_v17  ;;  %v4417_v23 = vadd.f32 %v4416_v21, %v4415_v15  ;;  %v4306_v24 = vpop.f32.mrf.mxu0 }
 0x181   : > { %v866_v26 = vmax.f32 %v834_v19, 0.0  ;;  %v797_v27 = vmul.f32 %v4305_v20, %v5527_v40  ;;  %v4418_v28 = vpop.f32.mrf.mxu1 }
 0x182   : > { %v1603_v30 = vmax.f32 %v1571_v22, 0.0  ;;  %v1540_v31 = vmul.f32 %v4417_v23, %v5527_v40  ;;  %v4307_v32 = vpop.f32.mrf.mxu0 }
 0x183   : > { %v3894_v33 = vpack.c.bf16 %v866_v26, %v865_v25  ;;  %v4308_v34 = vadd.f32 %v4307_v32, %v4306_v24  ;;  %v4419_v35 = vpop.f32.mrf.mxu1  ;;  %v835_v39 = vadd.f32 %v5533_v51, %v797_v27 }
 0x184   : > { %v3974_v36 = vpack.c.bf16 %v1603_v30, %v1602_v29  ;;  %v4420_v37 = vadd.f32 %v4419_v35, %v4418_v28  ;;  %v4309_v38 = vpop.f32.mrf.mxu0  ;;  %v1572_v43 = vadd.f32 %v5533_v51, %v1540_v31 }
 0x185   : > { %4182 = vst [vmem:[%s5550_s25 + $0x38] sm:$0xff] %v3894_v33   ;;  %v798_v41 = vmul.f32 %v4308_v34, %v5527_v40  ;;  %v4421_v42 = vpop.f32.mrf.mxu1  ;;  %v867_v53 = vmax.f32 %v835_v39, 0.0 }
 0x186   : > { %4198 = vst [vmem:[%s5550_s25 + $0xb8] sm:$0xff] %v3974_v36   ;;  %v1541_v44 = vmul.f32 %v4420_v37, %v5527_v40  ;;  %v4310_v45 = vpop.f32.mrf.mxu0  ;;  %v1604_v57 = vmax.f32 %v1572_v43, 0.0 }
 0x187   : > { %v836_v46 = vadd.f32 %v5533_v51, %v798_v41  ;;  %v4311_v47 = vadd.f32 %v4310_v45, %v4309_v38  ;;  %v4422_v48 = vpop.f32.mrf.mxu1 }
 0x188   : > { %v1573_v49 = vadd.f32 %v5533_v51, %v1541_v44  ;;  %v4423_v50 = vadd.f32 %v4422_v48, %v4421_v42  ;;  %v4312_v52 = vpop.f32.mrf.mxu0 }
 0x189   : > { %v868_v54 = vmax.f32 %v836_v46, 0.0  ;;  %v799_v55 = vmul.f32 %v4311_v47, %v5527_v40  ;;  %v4424_v56 = vpop.f32.mrf.mxu1 }
 0x18a   : > { %v1605_v58 = vmax.f32 %v1573_v49, 0.0  ;;  %v1542_v59 = vmul.f32 %v4423_v50, %v5527_v40  ;;  %v4313_v60 = vpop.f32.mrf.mxu0 }
 0x18b   : > { %v3899_v61 = vpack.c.bf16 %v868_v54, %v867_v53  ;;  %v4314_v62 = vadd.f32 %v4313_v60, %v4312_v52  ;;  %v4425_v63 = vpop.f32.mrf.mxu1  ;;  %v837_v3 = vadd.f32 %v5533_v51, %v799_v55 }
 0x18c   : > { %v3979_v0 = vpack.c.bf16 %v1605_v58, %v1604_v57  ;;  %v4426_v1 = vadd.f32 %v4425_v63, %v4424_v56  ;;  %v4315_v2 = vpop.f32.mrf.mxu0  ;;  %v1574_v6 = vadd.f32 %v5533_v51, %v1542_v59 }
 0x18d   : > { %4183 = vst [vmem:[%s5550_s25 + $0x40] sm:$0xff] %v3899_v61   ;;  %v800_v4 = vmul.f32 %v4314_v62, %v5527_v40  ;;  %v4427_v5 = vpop.f32.mrf.mxu1  ;;  %v869_v15 = vmax.f32 %v837_v3, 0.0 }
 0x18e   : > { %4199 = vst [vmem:[%s5550_s25 + $0xc0] sm:$0xff] %v3979_v0   ;;  %v1543_v7 = vmul.f32 %v4426_v1, %v5527_v40  ;;  %v4316_v8 = vpop.f32.mrf.mxu0  ;;  %v1606_v19 = vmax.f32 %v1574_v6, 0.0 }
 0x18f   : > { %v838_v9 = vadd.f32 %v5533_v51, %v800_v4  ;;  %v4317_v10 = vadd.f32 %v4316_v8, %v4315_v2  ;;  %v4428_v11 = vpop.f32.mrf.mxu1 }
 0x190   : > { %v1575_v12 = vadd.f32 %v5533_v51, %v1543_v7  ;;  %v4429_v13 = vadd.f32 %v4428_v11, %v4427_v5  ;;  %v4318_v14 = vpop.f32.mrf.mxu0 }
 0x191   : > { %v870_v16 = vmax.f32 %v838_v9, 0.0  ;;  %v801_v17 = vmul.f32 %v4317_v10, %v5527_v40  ;;  %v4430_v18 = vpop.f32.mrf.mxu1 }
 0x192   : > { %v1607_v20 = vmax.f32 %v1575_v12, 0.0  ;;  %v1544_v21 = vmul.f32 %v4429_v13, %v5527_v40  ;;  %v4319_v22 = vpop.f32.mrf.mxu0 }
 0x193   : > { %v3904_v23 = vpack.c.bf16 %v870_v16, %v869_v15  ;;  %v4320_v24 = vadd.f32 %v4319_v22, %v4318_v14  ;;  %v4431_v25 = vpop.f32.mrf.mxu1  ;;  %v839_v29 = vadd.f32 %v5533_v51, %v801_v17 }
 0x194   : > { %v3984_v26 = vpack.c.bf16 %v1607_v20, %v1606_v19  ;;  %v4432_v27 = vadd.f32 %v4431_v25, %v4430_v18  ;;  %v4321_v28 = vpop.f32.mrf.mxu0  ;;  %v1576_v32 = vadd.f32 %v5533_v51, %v1544_v21 }
 0x195   : > { %4184 = vst [vmem:[%s5550_s25 + $0x48] sm:$0xff] %v3904_v23   ;;  %v802_v30 = vmul.f32 %v4320_v24, %v5527_v40  ;;  %v4433_v31 = vpop.f32.mrf.mxu1  ;;  %v871_v42 = vmax.f32 %v839_v29, 0.0 }
 0x196   : > { %4200 = vst [vmem:[%s5550_s25 + $0xc8] sm:$0xff] %v3984_v26   ;;  %v1545_v33 = vmul.f32 %v4432_v27, %v5527_v40  ;;  %v4322_v34 = vpop.f32.mrf.mxu0  ;;  %v1608_v46 = vmax.f32 %v1576_v32, 0.0 }
 0x197   : > { %v840_v35 = vadd.f32 %v5533_v51, %v802_v30  ;;  %v4323_v36 = vadd.f32 %v4322_v34, %v4321_v28  ;;  %v4434_v37 = vpop.f32.mrf.mxu1 }
 0x198   : > { %v1577_v38 = vadd.f32 %v5533_v51, %v1545_v33  ;;  %v4435_v39 = vadd.f32 %v4434_v37, %v4433_v31  ;;  %v4324_v41 = vpop.f32.mrf.mxu0 }
 0x199   : > { %v872_v43 = vmax.f32 %v840_v35, 0.0  ;;  %v803_v44 = vmul.f32 %v4323_v36, %v5527_v40  ;;  %v4436_v45 = vpop.f32.mrf.mxu1 }
 0x19a   : > { %v1609_v47 = vmax.f32 %v1577_v38, 0.0  ;;  %v1546_v48 = vmul.f32 %v4435_v39, %v5527_v40  ;;  %v4325_v49 = vpop.f32.mrf.mxu0 }
 0x19b   : > { %v3909_v50 = vpack.c.bf16 %v872_v43, %v871_v42  ;;  %v4326_v52 = vadd.f32 %v4325_v49, %v4324_v41  ;;  %v4437_v53 = vpop.f32.mrf.mxu1  ;;  %v841_v57 = vadd.f32 %v5533_v51, %v803_v44 }
 0x19c   : > { %v3989_v54 = vpack.c.bf16 %v1609_v47, %v1608_v46  ;;  %v4438_v55 = vadd.f32 %v4437_v53, %v4436_v45  ;;  %v4327_v56 = vpop.f32.mrf.mxu0  ;;  %v1578_v60 = vadd.f32 %v5533_v51, %v1546_v48 }
 0x19d   : > { %4185 = vst [vmem:[%s5550_s25 + $0x50] sm:$0xff] %v3909_v50   ;;  %v804_v58 = vmul.f32 %v4326_v52, %v5527_v40  ;;  %v4439_v59 = vpop.f32.mrf.mxu1  ;;  %v873_v5 = vmax.f32 %v841_v57, 0.0 }
 0x19e   : > { %4201 = vst [vmem:[%s5550_s25 + $0xd0] sm:$0xff] %v3989_v54   ;;  %v1547_v61 = vmul.f32 %v4438_v55, %v5527_v40  ;;  %v4328_v62 = vpop.f32.mrf.mxu0  ;;  %v1610_v9 = vmax.f32 %v1578_v60, 0.0 }
 0x19f   : > { %v842_v63 = vadd.f32 %v5533_v51, %v804_v58  ;;  %v4329_v0 = vadd.f32 %v4328_v62, %v4327_v56  ;;  %v4440_v1 = vpop.f32.mrf.mxu1 }
 0x1a0   : > { %v1579_v2 = vadd.f32 %v5533_v51, %v1547_v61  ;;  %v4441_v3 = vadd.f32 %v4440_v1, %v4439_v59  ;;  %v4330_v4 = vpop.f32.mrf.mxu0 }
 0x1a1   : > { %v874_v6 = vmax.f32 %v842_v63, 0.0  ;;  %v805_v7 = vmul.f32 %v4329_v0, %v5527_v40  ;;  %v4442_v8 = vpop.f32.mrf.mxu1 }
 0x1a2   : > { %v1611_v10 = vmax.f32 %v1579_v2, 0.0  ;;  %v1548_v11 = vmul.f32 %v4441_v3, %v5527_v40  ;;  %v4331_v12 = vpop.f32.mrf.mxu0 }
 0x1a3   : > { %v3914_v13 = vpack.c.bf16 %v874_v6, %v873_v5  ;;  %v4332_v14 = vadd.f32 %v4331_v12, %v4330_v4  ;;  %v4443_v15 = vpop.f32.mrf.mxu1  ;;  %v843_v19 = vadd.f32 %v5533_v51, %v805_v7 }
 0x1a4   : > { %v3994_v16 = vpack.c.bf16 %v1611_v10, %v1610_v9  ;;  %v4444_v17 = vadd.f32 %v4443_v15, %v4442_v8  ;;  %v4333_v18 = vpop.f32.mrf.mxu0  ;;  %v1580_v22 = vadd.f32 %v5533_v51, %v1548_v11 }
 0x1a5   : > { %4186 = vst [vmem:[%s5550_s25 + $0x58] sm:$0xff] %v3914_v13   ;;  %v806_v20 = vmul.f32 %v4332_v14, %v5527_v40  ;;  %v4445_v21 = vpop.f32.mrf.mxu1  ;;  %v875_v31 = vmax.f32 %v843_v19, 0.0 }
 0x1a6   : > { %4202 = vst [vmem:[%s5550_s25 + $0xd8] sm:$0xff] %v3994_v16   ;;  %v1549_v23 = vmul.f32 %v4444_v17, %v5527_v40  ;;  %v4334_v24 = vpop.f32.mrf.mxu0  ;;  %v1612_v35 = vmax.f32 %v1580_v22, 0.0 }
 0x1a7   : > { %v844_v25 = vadd.f32 %v5533_v51, %v806_v20  ;;  %v4335_v26 = vadd.f32 %v4334_v24, %v4333_v18  ;;  %v4446_v27 = vpop.f32.mrf.mxu1 }
 0x1a8   : > { %v1581_v28 = vadd.f32 %v5533_v51, %v1549_v23  ;;  %v4447_v29 = vadd.f32 %v4446_v27, %v4445_v21  ;;  %v4336_v30 = vpop.f32.mrf.mxu0 }
 0x1a9   : > { %v876_v32 = vmax.f32 %v844_v25, 0.0  ;;  %v807_v33 = vmul.f32 %v4335_v26, %v5527_v40  ;;  %v4448_v34 = vpop.f32.mrf.mxu1 }
 0x1aa   : > { %v1613_v36 = vmax.f32 %v1581_v28, 0.0  ;;  %v1550_v37 = vmul.f32 %v4447_v29, %v5527_v40  ;;  %v4337_v38 = vpop.f32.mrf.mxu0 }
 0x1ab   : > { %v3919_v39 = vpack.c.bf16 %v876_v32, %v875_v31  ;;  %v4338_v41 = vadd.f32 %v4337_v38, %v4336_v30  ;;  %v4449_v42 = vpop.f32.mrf.mxu1  ;;  %v845_v46 = vadd.f32 %v5533_v51, %v807_v33 }
 0x1ac   : > { %v3999_v43 = vpack.c.bf16 %v1613_v36, %v1612_v35  ;;  %v4450_v44 = vadd.f32 %v4449_v42, %v4448_v34  ;;  %v4339_v45 = vpop.f32.mrf.mxu0  ;;  %v1582_v49 = vadd.f32 %v5533_v51, %v1550_v37 }
 0x1ad   : > { %4187 = vst [vmem:[%s5550_s25 + $0x60] sm:$0xff] %v3919_v39   ;;  %v808_v47 = vmul.f32 %v4338_v41, %v5527_v40  ;;  %v4451_v48 = vpop.f32.mrf.mxu1  ;;  %v877_v59 = vmax.f32 %v845_v46, 0.0 }
 0x1ae   : > { %4203 = vst [vmem:[%s5550_s25 + $0xe0] sm:$0xff] %v3999_v43   ;;  %v1551_v50 = vmul.f32 %v4450_v44, %v5527_v40  ;;  %v4340_v52 = vpop.f32.mrf.mxu0  ;;  %v1614_v63 = vmax.f32 %v1582_v49, 0.0 }
 0x1af   : > { %v846_v53 = vadd.f32 %v5533_v51, %v808_v47  ;;  %v4341_v54 = vadd.f32 %v4340_v52, %v4339_v45  ;;  %v4452_v55 = vpop.f32.mrf.mxu1 }
 0x1b0   : > { %v1583_v56 = vadd.f32 %v5533_v51, %v1551_v50  ;;  %v4453_v57 = vadd.f32 %v4452_v55, %v4451_v48  ;;  %v4342_v58 = vpop.f32.mrf.mxu0 }
 0x1b1   : > { %v878_v60 = vmax.f32 %v846_v53, 0.0  ;;  %v809_v61 = vmul.f32 %v4341_v54, %v5527_v40  ;;  %v4454_v62 = vpop.f32.mrf.mxu1 }
 0x1b2   : > { %v1615_v0 = vmax.f32 %v1583_v56, 0.0  ;;  %v1552_v1 = vmul.f32 %v4453_v57, %v5527_v40  ;;  %v4343_v2 = vpop.f32.mrf.mxu0 }
 0x1b3   : > { %v3924_v3 = vpack.c.bf16 %v878_v60, %v877_v59  ;;  %v4344_v4 = vadd.f32 %v4343_v2, %v4342_v58  ;;  %v4455_v5 = vpop.f32.mrf.mxu1  ;;  %v847_v9 = vadd.f32 %v5533_v51, %v809_v61 }
 0x1b4   : > { %v4004_v6 = vpack.c.bf16 %v1615_v0, %v1614_v63  ;;  %v4456_v7 = vadd.f32 %v4455_v5, %v4454_v62  ;;  %v4345_v8 = vpop.f32.mrf.mxu0  ;;  %v1584_v12 = vadd.f32 %v5533_v51, %v1552_v1  ;;  %v5722_v0 = vld [vmem:[#allocation7] ss:$0 sm:$0xff]  ;;  %v5728_v5 = vld [vmem:[#allocation8] ss:$0 sm:$0xff] }
 0x1b5   : > { %4188 = vst [vmem:[%s5550_s25 + $0x68] sm:$0xff] %v3924_v3   ;;  %v810_v10 = vmul.f32 %v4344_v4, %v5527_v40  ;;  %v4457_v11 = vpop.f32.mrf.mxu1  ;;  %v879_v21 = vmax.f32 %v847_v9, 0.0 }
 0x1b6   : > { %4204 = vst [vmem:[%s5550_s25 + $0xe8] sm:$0xff] %v4004_v6   ;;  %v1553_v13 = vmul.f32 %v4456_v7, %v5527_v40  ;;  %v4346_v14 = vpop.f32.mrf.mxu0  ;;  %v1616_v25 = vmax.f32 %v1584_v12, 0.0 }
 0x1b7   : > { %v848_v15 = vadd.f32 %v5533_v51, %v810_v10  ;;  %v4347_v16 = vadd.f32 %v4346_v14, %v4345_v8  ;;  %v4458_v17 = vpop.f32.mrf.mxu1 }
 0x1b8   : > { %v1585_v18 = vadd.f32 %v5533_v51, %v1553_v13  ;;  %v4459_v19 = vadd.f32 %v4458_v17, %v4457_v11  ;;  %v4348_v20 = vpop.f32.mrf.mxu0 }
 0x1b9   : > { %v880_v22 = vmax.f32 %v848_v15, 0.0  ;;  %v811_v23 = vmul.f32 %v4347_v16, %v5527_v40  ;;  %v4460_v24 = vpop.f32.mrf.mxu1 }
 0x1ba   : > { %v1617_v26 = vmax.f32 %v1585_v18, 0.0  ;;  %v1554_v27 = vmul.f32 %v4459_v19, %v5527_v40  ;;  %v4349_v28 = vpop.f32.mrf.mxu0 }
 0x1bb   : > { %v3929_v29 = vpack.c.bf16 %v880_v22, %v879_v21  ;;  %v4350_v30 = vadd.f32 %v4349_v28, %v4348_v20  ;;  %v4461_v31 = vpop.f32.mrf.mxu1  ;;  %v849_v35 = vadd.f32 %v5533_v51, %v811_v23 }
 0x1bc   : > { %v4009_v32 = vpack.c.bf16 %v1617_v26, %v1616_v25  ;;  %v4462_v33 = vadd.f32 %v4461_v31, %v4460_v24  ;;  %v4479_v34 = vpop.f32.mrf.mxu0  ;;  %v1586_v38 = vadd.f32 %v5533_v51, %v1554_v27 }
 0x1bd   : > { %4189 = vst [vmem:[%s5550_s25 + $0x70] sm:$0xff] %v3929_v29   ;;  %v812_v36 = vmul.f32 %v4350_v30, %v5527_v40  ;;  %v4591_v37 = vpop.f32.mrf.mxu1  ;;  %v881_v48 = vmax.f32 %v849_v35, 0.0 }
 0x1be   : > { %4205 = vst [vmem:[%s5550_s25 + $0xf0] sm:$0xff] %v4009_v32   ;;  %v1555_v39 = vmul.f32 %v4462_v33, %v5527_v40  ;;  %v4480_v41 = vpop.f32.mrf.mxu0  ;;  %v1618_v53 = vmax.f32 %v1586_v38, 0.0 }
 0x1bf   : > { %v850_v42 = vadd.f32 %v5533_v51, %v812_v36  ;;  %v4481_v43 = vadd.f32 %v4480_v41, %v4479_v34  ;;  %v4592_v44 = vpop.f32.mrf.mxu1 }
 0x1c0   : > { %v1587_v45 = vadd.f32 %v5533_v51, %v1555_v39  ;;  %v4593_v46 = vadd.f32 %v4592_v44, %v4591_v37  ;;  %v4482_v47 = vpop.f32.mrf.mxu0 }
 0x1c1   : > { %v882_v49 = vmax.f32 %v850_v42, 0.0  ;;  %v2261_v50 = vmul.f32 %v4481_v43, %v5527_v40  ;;  %v4594_v52 = vpop.f32.mrf.mxu1 }
 0x1c2   : > { %v1619_v54 = vmax.f32 %v1587_v45, 0.0  ;;  %v2998_v55 = vmul.f32 %v4593_v46, %v5527_v40  ;;  %v4483_v56 = vpop.f32.mrf.mxu0 }
 0x1c3   : > { %v3934_v57 = vpack.c.bf16 %v882_v49, %v881_v48  ;;  %v4484_v58 = vadd.f32 %v4483_v56, %v4482_v47  ;;  %v4595_v59 = vpop.f32.mrf.mxu1  ;;  %v2293_v63 = vadd.f32 %v5533_v51, %v2261_v50 }
 0x1c4   : > { %v4014_v60 = vpack.c.bf16 %v1619_v54, %v1618_v53  ;;  %v4596_v61 = vadd.f32 %v4595_v59, %v4594_v52  ;;  %v4485_v62 = vpop.f32.mrf.mxu0  ;;  %v3030_v3 = vadd.f32 %v5533_v51, %v2998_v55 }
 0x1c5   : > { %4190 = vst [vmem:[%s5550_s25 + $0x78] sm:$0xff] %v3934_v57   ;;  %v2262_v1 = vmul.f32 %v5722_v0, %v4484_v58  ;;  %v4597_v2 = vpop.f32.mrf.mxu1  ;;  %v2325_v12 = vmax.f32 %v2293_v63, 0.0 }
 0x1c6   : > { %4206 = vst [vmem:[%s5550_s25 + $0xf8] sm:$0xff] %v4014_v60   ;;  %v2999_v40 = vmul.f32 %v5722_v0, %v4596_v61  ;;  %v4486_v4 = vpop.f32.mrf.mxu0  ;;  %v3062_v15 = vmax.f32 %v3030_v3, 0.0 }
 0x1c7   : > { %v2294_v6 = vadd.f32 %v5728_v5, %v2262_v1  ;;  %v4487_v7 = vadd.f32 %v4486_v4, %v4485_v62  ;;  %v4598_v8 = vpop.f32.mrf.mxu1 }
 0x1c8   : > { %v3031_v9 = vadd.f32 %v5728_v5, %v2999_v40  ;;  %v4599_v10 = vadd.f32 %v4598_v8, %v4597_v2  ;;  %v4488_v11 = vpop.f32.mrf.mxu0 }
 0x1c9   : > { %v2326_v13 = vmax.f32 %v2294_v6, 0.0  ;;  %v2263_v14 = vmul.f32 %v5722_v0, %v4487_v7  ;;  %v4600_v51 = vpop.f32.mrf.mxu1 }
 0x1ca   : > { %v3063_v16 = vmax.f32 %v3031_v9, 0.0  ;;  %v3000_v17 = vmul.f32 %v5722_v0, %v4599_v10  ;;  %v4489_v18 = vpop.f32.mrf.mxu0 }
 0x1cb   : > { %v4019_v19 = vpack.c.bf16 %v2326_v13, %v2325_v12  ;;  %v4490_v20 = vadd.f32 %v4489_v18, %v4488_v11  ;;  %v4601_v21 = vpop.f32.mrf.mxu1  ;;  %v2295_v25 = vadd.f32 %v5728_v5, %v2263_v14 }
 0x1cc   : > { %v4099_v22 = vpack.c.bf16 %v3063_v16, %v3062_v15  ;;  %v4602_v23 = vadd.f32 %v4601_v21, %v4600_v51  ;;  %v4491_v24 = vpop.f32.mrf.mxu0  ;;  %v3032_v28 = vadd.f32 %v5728_v5, %v3000_v17 }
 0x1cd   : > { %4207 = vst [vmem:[%s5550_s25 + $0x100] sm:$0xff] %v4019_v19   ;;  %v2264_v26 = vmul.f32 %v5722_v0, %v4490_v20  ;;  %v4603_v27 = vpop.f32.mrf.mxu1  ;;  %v2327_v37 = vmax.f32 %v2295_v25, 0.0 }
 0x1ce   : > { %4223 = vst [vmem:[%s5550_s25 + $0x180] sm:$0xff] %v4099_v22   ;;  %v3001_v29 = vmul.f32 %v5722_v0, %v4602_v23  ;;  %v4492_v30 = vpop.f32.mrf.mxu0  ;;  %v3064_v42 = vmax.f32 %v3032_v28, 0.0 }
 0x1cf   : > { %v2296_v31 = vadd.f32 %v5728_v5, %v2264_v26  ;;  %v4493_v32 = vadd.f32 %v4492_v30, %v4491_v24  ;;  %v4604_v33 = vpop.f32.mrf.mxu1 }
 0x1d0   : > { %v3033_v34 = vadd.f32 %v5728_v5, %v3001_v29  ;;  %v4605_v35 = vadd.f32 %v4604_v33, %v4603_v27  ;;  %v4494_v36 = vpop.f32.mrf.mxu0 }
 0x1d1   : > { %v2328_v38 = vmax.f32 %v2296_v31, 0.0  ;;  %v2265_v39 = vmul.f32 %v5722_v0, %v4493_v32  ;;  %v4606_v41 = vpop.f32.mrf.mxu1 }
 0x1d2   : > { %v3065_v43 = vmax.f32 %v3033_v34, 0.0  ;;  %v3002_v44 = vmul.f32 %v5722_v0, %v4605_v35  ;;  %v4495_v45 = vpop.f32.mrf.mxu0 }
 0x1d3   : > { %v4024_v46 = vpack.c.bf16 %v2328_v38, %v2327_v37  ;;  %v4496_v47 = vadd.f32 %v4495_v45, %v4494_v36  ;;  %v4607_v48 = vpop.f32.mrf.mxu1  ;;  %v2297_v53 = vadd.f32 %v5728_v5, %v2265_v39 }
 0x1d4   : > { %v4104_v49 = vpack.c.bf16 %v3065_v43, %v3064_v42  ;;  %v4608_v50 = vadd.f32 %v4607_v48, %v4606_v41  ;;  %v4497_v52 = vpop.f32.mrf.mxu0  ;;  %v3034_v56 = vadd.f32 %v5728_v5, %v3002_v44 }
 0x1d5   : > { %4208 = vst [vmem:[%s5550_s25 + $0x108] sm:$0xff] %v4024_v46   ;;  %v2266_v54 = vmul.f32 %v5722_v0, %v4496_v47  ;;  %v4609_v55 = vpop.f32.mrf.mxu1  ;;  %v2329_v2 = vmax.f32 %v2297_v53, 0.0 }
 0x1d6   : > { %4224 = vst [vmem:[%s5550_s25 + $0x188] sm:$0xff] %v4104_v49   ;;  %v3003_v57 = vmul.f32 %v5722_v0, %v4608_v50  ;;  %v4498_v58 = vpop.f32.mrf.mxu0  ;;  %v3066_v6 = vmax.f32 %v3034_v56, 0.0 }
 0x1d7   : > { %v2298_v59 = vadd.f32 %v5728_v5, %v2266_v54  ;;  %v4499_v60 = vadd.f32 %v4498_v58, %v4497_v52  ;;  %v4610_v61 = vpop.f32.mrf.mxu1 }
 0x1d8   : > { %v3035_v62 = vadd.f32 %v5728_v5, %v3003_v57  ;;  %v4611_v63 = vadd.f32 %v4610_v61, %v4609_v55  ;;  %v4500_v1 = vpop.f32.mrf.mxu0 }
 0x1d9   : > { %v2330_v3 = vmax.f32 %v2298_v59, 0.0  ;;  %v2267_v40 = vmul.f32 %v5722_v0, %v4499_v60  ;;  %v4612_v4 = vpop.f32.mrf.mxu1 }
 0x1da   : > { %v3067_v7 = vmax.f32 %v3035_v62, 0.0  ;;  %v3004_v8 = vmul.f32 %v5722_v0, %v4611_v63  ;;  %v4501_v9 = vpop.f32.mrf.mxu0 }
 0x1db   : > { %v4029_v10 = vpack.c.bf16 %v2330_v3, %v2329_v2  ;;  %v4502_v11 = vadd.f32 %v4501_v9, %v4500_v1  ;;  %v4613_v12 = vpop.f32.mrf.mxu1  ;;  %v2299_v15 = vadd.f32 %v5728_v5, %v2267_v40 }
 0x1dc   : > { %v4109_v13 = vpack.c.bf16 %v3067_v7, %v3066_v6  ;;  %v4614_v14 = vadd.f32 %v4613_v12, %v4612_v4  ;;  %v4503_v51 = vpop.f32.mrf.mxu0  ;;  %v3036_v18 = vadd.f32 %v5728_v5, %v3004_v8 }
 0x1dd   : > { %4209 = vst [vmem:[%s5550_s25 + $0x110] sm:$0xff] %v4029_v10   ;;  %v2268_v16 = vmul.f32 %v5722_v0, %v4502_v11  ;;  %v4615_v17 = vpop.f32.mrf.mxu1  ;;  %v2331_v27 = vmax.f32 %v2299_v15, 0.0 }
 0x1de   : > { %4225 = vst [vmem:[%s5550_s25 + $0x190] sm:$0xff] %v4109_v13   ;;  %v3005_v19 = vmul.f32 %v5722_v0, %v4614_v14  ;;  %v4504_v20 = vpop.f32.mrf.mxu0  ;;  %v3068_v31 = vmax.f32 %v3036_v18, 0.0 }
 0x1df   : > { %v2300_v21 = vadd.f32 %v5728_v5, %v2268_v16  ;;  %v4505_v22 = vadd.f32 %v4504_v20, %v4503_v51  ;;  %v4616_v23 = vpop.f32.mrf.mxu1 }
 0x1e0   : > { %v3037_v24 = vadd.f32 %v5728_v5, %v3005_v19  ;;  %v4617_v25 = vadd.f32 %v4616_v23, %v4615_v17  ;;  %v4506_v26 = vpop.f32.mrf.mxu0 }
 0x1e1   : > { %v2332_v28 = vmax.f32 %v2300_v21, 0.0  ;;  %v2269_v29 = vmul.f32 %v5722_v0, %v4505_v22  ;;  %v4618_v30 = vpop.f32.mrf.mxu1 }
 0x1e2   : > { %v3069_v32 = vmax.f32 %v3037_v24, 0.0  ;;  %v3006_v33 = vmul.f32 %v5722_v0, %v4617_v25  ;;  %v4507_v34 = vpop.f32.mrf.mxu0 }
 0x1e3   : > { %v4034_v35 = vpack.c.bf16 %v2332_v28, %v2331_v27  ;;  %v4508_v36 = vadd.f32 %v4507_v34, %v4506_v26  ;;  %v4619_v37 = vpop.f32.mrf.mxu1  ;;  %v2301_v42 = vadd.f32 %v5728_v5, %v2269_v29 }
 0x1e4   : > { %v4114_v38 = vpack.c.bf16 %v3069_v32, %v3068_v31  ;;  %v4620_v39 = vadd.f32 %v4619_v37, %v4618_v30  ;;  %v4509_v41 = vpop.f32.mrf.mxu0  ;;  %v3038_v45 = vadd.f32 %v5728_v5, %v3006_v33 }
 0x1e5   : > { %4210 = vst [vmem:[%s5550_s25 + $0x118] sm:$0xff] %v4034_v35   ;;  %v2270_v43 = vmul.f32 %v5722_v0, %v4508_v36  ;;  %v4621_v44 = vpop.f32.mrf.mxu1  ;;  %v2333_v55 = vmax.f32 %v2301_v42, 0.0 }
 0x1e6   : > { %4226 = vst [vmem:[%s5550_s25 + $0x198] sm:$0xff] %v4114_v38   ;;  %v3007_v46 = vmul.f32 %v5722_v0, %v4620_v39  ;;  %v4510_v47 = vpop.f32.mrf.mxu0  ;;  %v3070_v59 = vmax.f32 %v3038_v45, 0.0 }
 0x1e7   : > { %v2302_v48 = vadd.f32 %v5728_v5, %v2270_v43  ;;  %v4511_v49 = vadd.f32 %v4510_v47, %v4509_v41  ;;  %v4622_v50 = vpop.f32.mrf.mxu1 }
 0x1e8   : > { %v3039_v52 = vadd.f32 %v5728_v5, %v3007_v46  ;;  %v4623_v53 = vadd.f32 %v4622_v50, %v4621_v44  ;;  %v4512_v54 = vpop.f32.mrf.mxu0 }
 0x1e9   : > { %v2334_v56 = vmax.f32 %v2302_v48, 0.0  ;;  %v2271_v57 = vmul.f32 %v5722_v0, %v4511_v49  ;;  %v4624_v58 = vpop.f32.mrf.mxu1 }
 0x1ea   : > { %v3071_v60 = vmax.f32 %v3039_v52, 0.0  ;;  %v3008_v61 = vmul.f32 %v5722_v0, %v4623_v53  ;;  %v4513_v62 = vpop.f32.mrf.mxu0 }
 0x1eb   : > { %v4039_v63 = vpack.c.bf16 %v2334_v56, %v2333_v55  ;;  %v4514_v1 = vadd.f32 %v4513_v62, %v4512_v54  ;;  %v4625_v2 = vpop.f32.mrf.mxu1  ;;  %v2303_v6 = vadd.f32 %v5728_v5, %v2271_v57 }
 0x1ec   : > { %v4119_v3 = vpack.c.bf16 %v3071_v60, %v3070_v59  ;;  %v4626_v40 = vadd.f32 %v4625_v2, %v4624_v58  ;;  %v4515_v4 = vpop.f32.mrf.mxu0  ;;  %v3040_v9 = vadd.f32 %v5728_v5, %v3008_v61 }
 0x1ed   : > { %4211 = vst [vmem:[%s5550_s25 + $0x120] sm:$0xff] %v4039_v63   ;;  %v2272_v7 = vmul.f32 %v5722_v0, %v4514_v1  ;;  %v4627_v8 = vpop.f32.mrf.mxu1  ;;  %v2335_v17 = vmax.f32 %v2303_v6, 0.0 }
 0x1ee   : > { %4227 = vst [vmem:[%s5550_s25 + $0x1a0] sm:$0xff] %v4119_v3   ;;  %v3009_v10 = vmul.f32 %v5722_v0, %v4626_v40  ;;  %v4516_v11 = vpop.f32.mrf.mxu0  ;;  %v3072_v21 = vmax.f32 %v3040_v9, 0.0 }
 0x1ef   : > { %v2304_v12 = vadd.f32 %v5728_v5, %v2272_v7  ;;  %v4517_v13 = vadd.f32 %v4516_v11, %v4515_v4  ;;  %v4628_v14 = vpop.f32.mrf.mxu1 }
 0x1f0   : > { %v3041_v51 = vadd.f32 %v5728_v5, %v3009_v10  ;;  %v4629_v15 = vadd.f32 %v4628_v14, %v4627_v8  ;;  %v4518_v16 = vpop.f32.mrf.mxu0 }
 0x1f1   : > { %v2336_v18 = vmax.f32 %v2304_v12, 0.0  ;;  %v2273_v19 = vmul.f32 %v5722_v0, %v4517_v13  ;;  %v4630_v20 = vpop.f32.mrf.mxu1 }
 0x1f2   : > { %v3073_v22 = vmax.f32 %v3041_v51, 0.0  ;;  %v3010_v23 = vmul.f32 %v5722_v0, %v4629_v15  ;;  %v4519_v24 = vpop.f32.mrf.mxu0 }
 0x1f3   : > { %v4044_v25 = vpack.c.bf16 %v2336_v18, %v2335_v17  ;;  %v4520_v26 = vadd.f32 %v4519_v24, %v4518_v16  ;;  %v4631_v27 = vpop.f32.mrf.mxu1  ;;  %v2305_v31 = vadd.f32 %v5728_v5, %v2273_v19 }
 0x1f4   : > { %v4124_v28 = vpack.c.bf16 %v3073_v22, %v3072_v21  ;;  %v4632_v29 = vadd.f32 %v4631_v27, %v4630_v20  ;;  %v4521_v30 = vpop.f32.mrf.mxu0  ;;  %v3042_v34 = vadd.f32 %v5728_v5, %v3010_v23 }
 0x1f5   : > { %4212 = vst [vmem:[%s5550_s25 + $0x128] sm:$0xff] %v4044_v25   ;;  %v2274_v32 = vmul.f32 %v5722_v0, %v4520_v26  ;;  %v4633_v33 = vpop.f32.mrf.mxu1  ;;  %v2337_v44 = vmax.f32 %v2305_v31, 0.0 }
 0x1f6   : > { %4228 = vst [vmem:[%s5550_s25 + $0x1a8] sm:$0xff] %v4124_v28   ;;  %v3011_v35 = vmul.f32 %v5722_v0, %v4632_v29  ;;  %v4522_v36 = vpop.f32.mrf.mxu0  ;;  %v3074_v48 = vmax.f32 %v3042_v34, 0.0 }
 0x1f7   : > { %v2306_v37 = vadd.f32 %v5728_v5, %v2274_v32  ;;  %v4523_v38 = vadd.f32 %v4522_v36, %v4521_v30  ;;  %v4634_v39 = vpop.f32.mrf.mxu1 }
 0x1f8   : > { %v3043_v41 = vadd.f32 %v5728_v5, %v3011_v35  ;;  %v4635_v42 = vadd.f32 %v4634_v39, %v4633_v33  ;;  %v4524_v43 = vpop.f32.mrf.mxu0 }
 0x1f9   : > { %v2338_v45 = vmax.f32 %v2306_v37, 0.0  ;;  %v2275_v46 = vmul.f32 %v5722_v0, %v4523_v38  ;;  %v4636_v47 = vpop.f32.mrf.mxu1 }
 0x1fa   : > { %v3075_v49 = vmax.f32 %v3043_v41, 0.0  ;;  %v3012_v50 = vmul.f32 %v5722_v0, %v4635_v42  ;;  %v4525_v52 = vpop.f32.mrf.mxu0 }
 0x1fb   : > { %v4049_v53 = vpack.c.bf16 %v2338_v45, %v2337_v44  ;;  %v4526_v54 = vadd.f32 %v4525_v52, %v4524_v43  ;;  %v4637_v55 = vpop.f32.mrf.mxu1  ;;  %v2307_v59 = vadd.f32 %v5728_v5, %v2275_v46 }
 0x1fc   : > { %v4129_v56 = vpack.c.bf16 %v3075_v49, %v3074_v48  ;;  %v4638_v57 = vadd.f32 %v4637_v55, %v4636_v47  ;;  %v4527_v58 = vpop.f32.mrf.mxu0  ;;  %v3044_v62 = vadd.f32 %v5728_v5, %v3012_v50 }
 0x1fd   : > { %4213 = vst [vmem:[%s5550_s25 + $0x130] sm:$0xff] %v4049_v53   ;;  %v2276_v60 = vmul.f32 %v5722_v0, %v4526_v54  ;;  %v4639_v61 = vpop.f32.mrf.mxu1  ;;  %v2339_v8 = vmax.f32 %v2307_v59, 0.0 }
 0x1fe   : > { %4229 = vst [vmem:[%s5550_s25 + $0x1b0] sm:$0xff] %v4129_v56   ;;  %v3013_v63 = vmul.f32 %v5722_v0, %v4638_v57  ;;  %v4528_v1 = vpop.f32.mrf.mxu0  ;;  %v3076_v12 = vmax.f32 %v3044_v62, 0.0 }
 0x1ff   : > { %v2308_v2 = vadd.f32 %v5728_v5, %v2276_v60  ;;  %v4529_v3 = vadd.f32 %v4528_v1, %v4527_v58  ;;  %v4640_v40 = vpop.f32.mrf.mxu1 }
 0x200   : > { %v3045_v4 = vadd.f32 %v5728_v5, %v3013_v63  ;;  %v4641_v6 = vadd.f32 %v4640_v40, %v4639_v61  ;;  %v4530_v7 = vpop.f32.mrf.mxu0 }
 0x201   : > { %v2340_v9 = vmax.f32 %v2308_v2, 0.0  ;;  %v2277_v10 = vmul.f32 %v5722_v0, %v4529_v3  ;;  %v4642_v11 = vpop.f32.mrf.mxu1 }
 0x202   : > { %v3077_v13 = vmax.f32 %v3045_v4, 0.0  ;;  %v3014_v14 = vmul.f32 %v5722_v0, %v4641_v6  ;;  %v4531_v51 = vpop.f32.mrf.mxu0 }
 0x203   : > { %v4054_v15 = vpack.c.bf16 %v2340_v9, %v2339_v8  ;;  %v4532_v16 = vadd.f32 %v4531_v51, %v4530_v7  ;;  %v4643_v17 = vpop.f32.mrf.mxu1  ;;  %v2309_v21 = vadd.f32 %v5728_v5, %v2277_v10 }
 0x204   : > { %v4134_v18 = vpack.c.bf16 %v3077_v13, %v3076_v12  ;;  %v4644_v19 = vadd.f32 %v4643_v17, %v4642_v11  ;;  %v4533_v20 = vpop.f32.mrf.mxu0  ;;  %v3046_v24 = vadd.f32 %v5728_v5, %v3014_v14 }
 0x205   : > { %4214 = vst [vmem:[%s5550_s25 + $0x138] sm:$0xff] %v4054_v15   ;;  %v2278_v22 = vmul.f32 %v5722_v0, %v4532_v16  ;;  %v4645_v23 = vpop.f32.mrf.mxu1  ;;  %v2341_v33 = vmax.f32 %v2309_v21, 0.0 }
 0x206   : > { %4230 = vst [vmem:[%s5550_s25 + $0x1b8] sm:$0xff] %v4134_v18   ;;  %v3015_v25 = vmul.f32 %v5722_v0, %v4644_v19  ;;  %v4534_v26 = vpop.f32.mrf.mxu0  ;;  %v3078_v37 = vmax.f32 %v3046_v24, 0.0 }
 0x207   : > { %v2310_v27 = vadd.f32 %v5728_v5, %v2278_v22  ;;  %v4535_v28 = vadd.f32 %v4534_v26, %v4533_v20  ;;  %v4646_v29 = vpop.f32.mrf.mxu1 }
 0x208   : > { %v3047_v30 = vadd.f32 %v5728_v5, %v3015_v25  ;;  %v4647_v31 = vadd.f32 %v4646_v29, %v4645_v23  ;;  %v4536_v32 = vpop.f32.mrf.mxu0 }
 0x209   : > { %v2342_v34 = vmax.f32 %v2310_v27, 0.0  ;;  %v2279_v35 = vmul.f32 %v5722_v0, %v4535_v28  ;;  %v4648_v36 = vpop.f32.mrf.mxu1 }
 0x20a   : > { %v3079_v38 = vmax.f32 %v3047_v30, 0.0  ;;  %v3016_v39 = vmul.f32 %v5722_v0, %v4647_v31  ;;  %v4537_v41 = vpop.f32.mrf.mxu0 }
 0x20b   : > { %v4059_v42 = vpack.c.bf16 %v2342_v34, %v2341_v33  ;;  %v4538_v43 = vadd.f32 %v4537_v41, %v4536_v32  ;;  %v4649_v44 = vpop.f32.mrf.mxu1  ;;  %v2311_v48 = vadd.f32 %v5728_v5, %v2279_v35 }
 0x20c   : > { %v4139_v45 = vpack.c.bf16 %v3079_v38, %v3078_v37  ;;  %v4650_v46 = vadd.f32 %v4649_v44, %v4648_v36  ;;  %v4539_v47 = vpop.f32.mrf.mxu0  ;;  %v3048_v52 = vadd.f32 %v5728_v5, %v3016_v39 }
 0x20d   : > { %4215 = vst [vmem:[%s5550_s25 + $0x140] sm:$0xff] %v4059_v42   ;;  %v2280_v49 = vmul.f32 %v5722_v0, %v4538_v43  ;;  %v4651_v50 = vpop.f32.mrf.mxu1  ;;  %v2343_v61 = vmax.f32 %v2311_v48, 0.0 }
 0x20e   : > { %4231 = vst [vmem:[%s5550_s25 + $0x1c0] sm:$0xff] %v4139_v45   ;;  %v3017_v53 = vmul.f32 %v5722_v0, %v4650_v46  ;;  %v4540_v54 = vpop.f32.mrf.mxu0  ;;  %v3080_v2 = vmax.f32 %v3048_v52, 0.0 }
 0x20f   : > { %v2312_v55 = vadd.f32 %v5728_v5, %v2280_v49  ;;  %v4541_v56 = vadd.f32 %v4540_v54, %v4539_v47  ;;  %v4652_v57 = vpop.f32.mrf.mxu1 }
 0x210   : > { %v3049_v58 = vadd.f32 %v5728_v5, %v3017_v53  ;;  %v4653_v59 = vadd.f32 %v4652_v57, %v4651_v50  ;;  %v4542_v60 = vpop.f32.mrf.mxu0 }
 0x211   : > { %v2344_v62 = vmax.f32 %v2312_v55, 0.0  ;;  %v2281_v63 = vmul.f32 %v5722_v0, %v4541_v56  ;;  %v4654_v1 = vpop.f32.mrf.mxu1 }
 0x212   : > { %v3081_v3 = vmax.f32 %v3049_v58, 0.0  ;;  %v3018_v40 = vmul.f32 %v5722_v0, %v4653_v59  ;;  %v4543_v4 = vpop.f32.mrf.mxu0 }
 0x213   : > { %v4064_v6 = vpack.c.bf16 %v2344_v62, %v2343_v61  ;;  %v4544_v7 = vadd.f32 %v4543_v4, %v4542_v60  ;;  %v4655_v8 = vpop.f32.mrf.mxu1  ;;  %v2313_v12 = vadd.f32 %v5728_v5, %v2281_v63 }
 0x214   : > { %v4144_v9 = vpack.c.bf16 %v3081_v3, %v3080_v2  ;;  %v4656_v10 = vadd.f32 %v4655_v8, %v4654_v1  ;;  %v4545_v11 = vpop.f32.mrf.mxu0  ;;  %v3050_v51 = vadd.f32 %v5728_v5, %v3018_v40 }
 0x215   : > { %4216 = vst [vmem:[%s5550_s25 + $0x148] sm:$0xff] %v4064_v6   ;;  %v2282_v13 = vmul.f32 %v5722_v0, %v4544_v7  ;;  %v4657_v14 = vpop.f32.mrf.mxu1  ;;  %v2345_v23 = vmax.f32 %v2313_v12, 0.0 }
 0x216   : > { %4232 = vst [vmem:[%s5550_s25 + $0x1c8] sm:$0xff] %v4144_v9   ;;  %v3019_v15 = vmul.f32 %v5722_v0, %v4656_v10  ;;  %v4546_v16 = vpop.f32.mrf.mxu0  ;;  %v3082_v27 = vmax.f32 %v3050_v51, 0.0 }
 0x217   : > { %v2314_v17 = vadd.f32 %v5728_v5, %v2282_v13  ;;  %v4547_v18 = vadd.f32 %v4546_v16, %v4545_v11  ;;  %v4658_v19 = vpop.f32.mrf.mxu1 }
 0x218   : > { %v3051_v20 = vadd.f32 %v5728_v5, %v3019_v15  ;;  %v4659_v21 = vadd.f32 %v4658_v19, %v4657_v14  ;;  %v4548_v22 = vpop.f32.mrf.mxu0 }
 0x219   : > { %v2346_v24 = vmax.f32 %v2314_v17, 0.0  ;;  %v2283_v25 = vmul.f32 %v5722_v0, %v4547_v18  ;;  %v4660_v26 = vpop.f32.mrf.mxu1 }
 0x21a   : > { %v3083_v28 = vmax.f32 %v3051_v20, 0.0  ;;  %v3020_v29 = vmul.f32 %v5722_v0, %v4659_v21  ;;  %v4549_v30 = vpop.f32.mrf.mxu0 }
 0x21b   : > { %v4069_v31 = vpack.c.bf16 %v2346_v24, %v2345_v23  ;;  %v4550_v32 = vadd.f32 %v4549_v30, %v4548_v22  ;;  %v4661_v33 = vpop.f32.mrf.mxu1  ;;  %v2315_v37 = vadd.f32 %v5728_v5, %v2283_v25 }
 0x21c   : > { %v4149_v34 = vpack.c.bf16 %v3083_v28, %v3082_v27  ;;  %v4662_v35 = vadd.f32 %v4661_v33, %v4660_v26  ;;  %v4551_v36 = vpop.f32.mrf.mxu0  ;;  %v3052_v41 = vadd.f32 %v5728_v5, %v3020_v29 }
 0x21d   : > { %4217 = vst [vmem:[%s5550_s25 + $0x150] sm:$0xff] %v4069_v31   ;;  %v2284_v38 = vmul.f32 %v5722_v0, %v4550_v32  ;;  %v4663_v39 = vpop.f32.mrf.mxu1  ;;  %v2347_v50 = vmax.f32 %v2315_v37, 0.0 }
 0x21e   : > { %4233 = vst [vmem:[%s5550_s25 + $0x1d0] sm:$0xff] %v4149_v34   ;;  %v3021_v42 = vmul.f32 %v5722_v0, %v4662_v35  ;;  %v4552_v43 = vpop.f32.mrf.mxu0  ;;  %v3084_v55 = vmax.f32 %v3052_v41, 0.0 }
 0x21f   : > { %v2316_v44 = vadd.f32 %v5728_v5, %v2284_v38  ;;  %v4553_v45 = vadd.f32 %v4552_v43, %v4551_v36  ;;  %v4664_v46 = vpop.f32.mrf.mxu1 }
 0x220   : > { %v3053_v47 = vadd.f32 %v5728_v5, %v3021_v42  ;;  %v4665_v48 = vadd.f32 %v4664_v46, %v4663_v39  ;;  %v4554_v49 = vpop.f32.mrf.mxu0 }
 0x221   : > { %v2348_v52 = vmax.f32 %v2316_v44, 0.0  ;;  %v2285_v53 = vmul.f32 %v5722_v0, %v4553_v45  ;;  %v4666_v54 = vpop.f32.mrf.mxu1 }
 0x222   : > { %v3085_v56 = vmax.f32 %v3053_v47, 0.0  ;;  %v3022_v57 = vmul.f32 %v5722_v0, %v4665_v48  ;;  %v4555_v58 = vpop.f32.mrf.mxu0 }
 0x223   : > { %v4074_v59 = vpack.c.bf16 %v2348_v52, %v2347_v50  ;;  %v4556_v60 = vadd.f32 %v4555_v58, %v4554_v49  ;;  %v4667_v61 = vpop.f32.mrf.mxu1  ;;  %v2317_v2 = vadd.f32 %v5728_v5, %v2285_v53 }
 0x224   : > { %v4154_v62 = vpack.c.bf16 %v3085_v56, %v3084_v55  ;;  %v4668_v63 = vadd.f32 %v4667_v61, %v4666_v54  ;;  %v4557_v1 = vpop.f32.mrf.mxu0  ;;  %v3054_v4 = vadd.f32 %v5728_v5, %v3022_v57 }
 0x225   : > { %4218 = vst [vmem:[%s5550_s25 + $0x158] sm:$0xff] %v4074_v59   ;;  %v2286_v3 = vmul.f32 %v5722_v0, %v4556_v60  ;;  %v4669_v40 = vpop.f32.mrf.mxu1  ;;  %v2349_v14 = vmax.f32 %v2317_v2, 0.0 }
 0x226   : > { %4234 = vst [vmem:[%s5550_s25 + $0x1d8] sm:$0xff] %v4154_v62   ;;  %v3023_v6 = vmul.f32 %v5722_v0, %v4668_v63  ;;  %v4558_v7 = vpop.f32.mrf.mxu0  ;;  %v3086_v17 = vmax.f32 %v3054_v4, 0.0 }
 0x227   : > { %v2318_v8 = vadd.f32 %v5728_v5, %v2286_v3  ;;  %v4559_v9 = vadd.f32 %v4558_v7, %v4557_v1  ;;  %v4670_v10 = vpop.f32.mrf.mxu1 }
 0x228   : > { %v3055_v11 = vadd.f32 %v5728_v5, %v3023_v6  ;;  %v4671_v12 = vadd.f32 %v4670_v10, %v4669_v40  ;;  %v4560_v13 = vpop.f32.mrf.mxu0 }
 0x229   : > { %v2350_v51 = vmax.f32 %v2318_v8, 0.0  ;;  %v2287_v15 = vmul.f32 %v5722_v0, %v4559_v9  ;;  %v4672_v16 = vpop.f32.mrf.mxu1 }
 0x22a   : > { %v3087_v18 = vmax.f32 %v3055_v11, 0.0  ;;  %v3024_v19 = vmul.f32 %v5722_v0, %v4671_v12  ;;  %v4561_v20 = vpop.f32.mrf.mxu0 }
 0x22b   : > { %v4079_v21 = vpack.c.bf16 %v2350_v51, %v2349_v14  ;;  %v4562_v22 = vadd.f32 %v4561_v20, %v4560_v13  ;;  %v4673_v23 = vpop.f32.mrf.mxu1  ;;  %v2319_v27 = vadd.f32 %v5728_v5, %v2287_v15 }
 0x22c   : > { %v4159_v24 = vpack.c.bf16 %v3087_v18, %v3086_v17  ;;  %v4674_v25 = vadd.f32 %v4673_v23, %v4672_v16  ;;  %v4563_v26 = vpop.f32.mrf.mxu0  ;;  %v3056_v30 = vadd.f32 %v5728_v5, %v3024_v19 }
 0x22d   : > { %4219 = vst [vmem:[%s5550_s25 + $0x160] sm:$0xff] %v4079_v21   ;;  %v2288_v28 = vmul.f32 %v5722_v0, %v4562_v22  ;;  %v4675_v29 = vpop.f32.mrf.mxu1  ;;  %v2351_v39 = vmax.f32 %v2319_v27, 0.0 }
 0x22e   : > { %4235 = vst [vmem:[%s5550_s25 + $0x1e0] sm:$0xff] %v4159_v24   ;;  %v3025_v31 = vmul.f32 %v5722_v0, %v4674_v25  ;;  %v4564_v32 = vpop.f32.mrf.mxu0  ;;  %v3088_v44 = vmax.f32 %v3056_v30, 0.0 }
 0x22f   : > { %v2320_v33 = vadd.f32 %v5728_v5, %v2288_v28  ;;  %v4565_v34 = vadd.f32 %v4564_v32, %v4563_v26  ;;  %v4676_v35 = vpop.f32.mrf.mxu1 }
 0x230   : > { %v3057_v36 = vadd.f32 %v5728_v5, %v3025_v31  ;;  %v4677_v37 = vadd.f32 %v4676_v35, %v4675_v29  ;;  %v4566_v38 = vpop.f32.mrf.mxu0 }
 0x231   : > { %v2352_v41 = vmax.f32 %v2320_v33, 0.0  ;;  %v2289_v42 = vmul.f32 %v5722_v0, %v4565_v34  ;;  %v4678_v43 = vpop.f32.mrf.mxu1 }
 0x232   : > { %v3089_v45 = vmax.f32 %v3057_v36, 0.0  ;;  %v3026_v46 = vmul.f32 %v5722_v0, %v4677_v37  ;;  %v4567_v47 = vpop.f32.mrf.mxu0 }
 0x233   : > { %v4084_v48 = vpack.c.bf16 %v2352_v41, %v2351_v39  ;;  %v4568_v49 = vadd.f32 %v4567_v47, %v4566_v38  ;;  %v4679_v50 = vpop.f32.mrf.mxu1  ;;  %v2321_v55 = vadd.f32 %v5728_v5, %v2289_v42 }
 0x234   : > { %v4164_v52 = vpack.c.bf16 %v3089_v45, %v3088_v44  ;;  %v4680_v53 = vadd.f32 %v4679_v50, %v4678_v43  ;;  %v4569_v54 = vpop.f32.mrf.mxu0  ;;  %v3058_v58 = vadd.f32 %v5728_v5, %v3026_v46 }
 0x235   : > { %4220 = vst [vmem:[%s5550_s25 + $0x168] sm:$0xff] %v4084_v48   ;;  %v2290_v56 = vmul.f32 %v5722_v0, %v4568_v49  ;;  %v4681_v57 = vpop.f32.mrf.mxu1  ;;  %v2353_v40 = vmax.f32 %v2321_v55, 0.0 }
 0x236   : > { %4236 = vst [vmem:[%s5550_s25 + $0x1e8] sm:$0xff] %v4164_v52   ;;  %v3027_v59 = vmul.f32 %v5722_v0, %v4680_v53  ;;  %v4570_v60 = vpop.f32.mrf.mxu0  ;;  %v3090_v8 = vmax.f32 %v3058_v58, 0.0 }
 0x237   : > { %v2322_v61 = vadd.f32 %v5728_v5, %v2290_v56  ;;  %v4571_v62 = vadd.f32 %v4570_v60, %v4569_v54  ;;  %v4682_v63 = vpop.f32.mrf.mxu1 }
 0x238   : > { %v3059_v1 = vadd.f32 %v5728_v5, %v3027_v59  ;;  %v4683_v2 = vadd.f32 %v4682_v63, %v4681_v57  ;;  %v4572_v3 = vpop.f32.mrf.mxu0 }
 0x239   : > { %v2354_v4 = vmax.f32 %v2322_v61, 0.0  ;;  %v2291_v6 = vmul.f32 %v5722_v0, %v4571_v62  ;;  %v4684_v7 = vpop.f32.mrf.mxu1 }
 0x23a   : > { %v3091_v9 = vmax.f32 %v3059_v1, 0.0  ;;  %v3028_v10 = vmul.f32 %v5722_v0, %v4683_v2  ;;  %v4573_v11 = vpop.f32.mrf.mxu0 }
 0x23b   : > { %v4089_v12 = vpack.c.bf16 %v2354_v4, %v2353_v40  ;;  %v4574_v13 = vadd.f32 %v4573_v11, %v4572_v3  ;;  %v4685_v14 = vpop.f32.mrf.mxu1  ;;  %v2323_v16 = vadd.f32 %v5728_v5, %v2291_v6 }
 0x23c   : > { %v4169_v51 = vpack.c.bf16 %v3091_v9, %v3090_v8  ;;  %v4686_v15 = vadd.f32 %v4685_v14, %v4684_v7  ;;  %v3060_v18 = vadd.f32 %v5728_v5, %v3028_v10 }
 0x23d   : > { %4221 = vst [vmem:[%s5550_s25 + $0x170] sm:$0xff] %v4089_v12   ;;  %v2292_v17 = vmul.f32 %v5722_v0, %v4574_v13  ;;  %v2355_v22 = vmax.f32 %v2323_v16, 0.0 }
 0x23e   : > { %4237 = vst [vmem:[%s5550_s25 + $0x1f0] sm:$0xff] %v4169_v51   ;;  %v3029_v19 = vmul.f32 %v5722_v0, %v4686_v15  ;;  %v3092_v24 = vmax.f32 %v3060_v18, 0.0 }
 0x23f   : > { %v2324_v20 = vadd.f32 %v5728_v5, %v2292_v17 }
 0x240   : > { %v3061_v21 = vadd.f32 %v5728_v5, %v3029_v19 }
 0x241   : > { %v2356_v23 = vmax.f32 %v2324_v20, 0.0 }
 0x242   : > { %v3093_v25 = vmax.f32 %v3061_v21, 0.0 }
 0x243   : > { %v4094_v26 = vpack.c.bf16 %v2356_v23, %v2355_v22 }
 0x244   : > { %v4174_v0 = vpack.c.bf16 %v3093_v25, %v3092_v24 }
 0x245   : > { %4222 = vst [vmem:[%s5550_s25 + $0x178] sm:$0xff] %v4094_v26  }
 0x246   : > { %4238 = vst [vmem:[%s5550_s25 + $0x1f8] sm:$0xff] %v4174_v0  }
 0x247   : > { %5166 = shalt.err (!%p5163_p1)
}
 0x248   : > { %s5167_s12 = scalar_lea.hbm %s5887_s28, 8192  ;;  %s5171_s13 = scalar_lea.hbm %s5943_s4, 16384 }
 0x249   : > { %p5168_p0 = scmp.ne.s32.totalorder %s5887_s28, %s5167_s12  ;;  %p5172_p5 = scmp.lt.s32.totalorder %s5887_s28, %s5943_s4 }
 0x24a   : > { %p5173_p10 = scmp.lt.s32.totalorder %s5171_s13, %s5167_s12 }
 0x24b   : > { %p5169_p4 = pnand %p5168_p0, %p5379_p3 }
 0x24c   : > { %p5174_p7 = por %p5173_p10, %p5172_p5 }
 0x24d   : > { %p5170_p12 = pneg %p5169_p4 }
 0x24f   : > { %p5175_p8 = pnand %p5174_p7, %p5170_p12 }
 0x251   : > { %5178 = shalt.err (!%p5175_p8)
}
 0x252   : > { %s5252_s23 = smov 64   ;;  %s5253_s25 = smov 4  }
 0x253   : > { %4704 = dma.vmem_to_hbm [thread:$0]  (%p5379_p3), %s5889_s14, 8192, %s5887_s28, %s3255_s18, %s5252_s23, %s5252_s23, %s5253_s25  }
 0x254 PF: > { %s3284_s27 = sand.u32 1, %s5221_s15   ;;  %p5961_p6 = scmp.ne.s32.totalorder %s5952_s26, 0 }
 0x255   : > { %p5962_p11 = scmp.ge.s32.totalorder %s5241_s20, 2  ;;  %s3285_s21 = scalar_lea.sflag [#allocation4], %s3284_s27 }
 0x257   : > { %p4721_p2 = pnand %p5962_p11, %p5961_p6 }
 0x259   : > { %p4722_p9 = pneg %p4721_p2 }
 0x25b   : > { %5216 = dma.done.wait (%p4722_p9), %s3285_s21, 8192  }
 0x25c   : > { %5218 = vsyncadd (%p4722_p9), %s3285_s21, 4294959104  ;;  %s22_s20 = sadd.s32 1, %s5241_s20   ;;  %s5963_s15 = smov %s5225_s16 }
 0x25d   : > { %p19_p13 = scmp.ge.s32.totalorder %s22_s20, 4   ;;  %s5964_s16 = smov %s5229_s17 }
 0x25e   : > { %s5965_s17 = smov %s5395_s24  ;;  %s5966_s18 = smov %s5237_s19 }
 0x25f   : > { %s5967_s19 = smov %s5969_s10  ;;  %21 = sbr.rel (!%p19_p13) target bundleno = 11 (0xb), region = 96 }
 0x264   :  { %3290 = vsyncpa [#allocation3], 1 }
 0x265   :  { %3292 = vsyncpa [#allocation3 + $0x1], 1 }
 0x266   :  { %3293 = vsyncpa [#allocation6], 1 }
 0x267   :  { %3294 = vsyncpa [#allocation9], 1 }
 0x268   :  { %3295 = vsyncpa [#allocation4], 1 }
 0x269   :  { %3297 = vsyncpa [#allocation4 + $0x1], 1 }

</bundles_post_ra>
